<compile_context>
chip_gen: v5e
topology: v5e:2x2
jax: 0.10.0
libtpu: 0.0.40
codegen_flags: <defaults>
</compile_context>

<pallas_src>
import math
from functools import partial

import jax
import jax.numpy as jnp
from jax.experimental import pallas as pl
from jax.experimental.pallas import tpu as pltpu


_HEAD_LANES = 128                 # lane-dense classifier output width (sliced to 2 in glue)
_NEG_INF = -1e30                  # bias for padded logit columns (vanishes in log-softmax)
_VMEM_LIMIT = 32 * 1024 * 1024    # safe scoped-VMEM budget on v5e / v6e / v7x


# ---------------------------------------------------------------------------
# Kernel
# ---------------------------------------------------------------------------
def _bert_kernel(x_ref, wqkv_ref, bqkv_ref, wo_ref, bo_ref,
                 ln1g_ref, ln1b_ref, w1_ref, b1_ref, w2_ref, b2_ref,
                 ln2g_ref, ln2b_ref, wc_ref, bc_ref,
                 cls_ref, act_ref, *, num_heads):
    """Fused post-LN BERT encoder stack + BinaryClassification head.

    Grid = (batch, layer).  The activation lives in an f32 VMEM scratch across
    the layer axis; per-layer weights are one block of the stacked [L, ...]
    arrays.  The Linear(H, 2) + LogSoftmax head runs on the last layer step.
    """
    layer = pl.program_id(1)
    n_layers = pl.num_programs(1)

    # First layer of this batch row: load the embedding activation into scratch.
    @pl.when(layer == 0)
    def _():
        act_ref[...] = x_ref[0]

    xf = act_ref[...]                                  # [S, H] f32 residual path
    x_bf = xf.astype(jnp.bfloat16)
    S, H = xf.shape
    hd = H // num_heads
    scale = 1.0 / math.sqrt(hd)

    # --- fused QKV projection: one full-width bf16 MXU matmul, f32 accum ---
    qkv = jnp.dot(x_bf, wqkv_ref[0],
                  preferred_element_type=jnp.float32) + bqkv_ref[0]     # [S, 3H] f32
    qkv_bf = qkv.astype(jnp.bfloat16)                  # single vreg-dense cast

    # --- multi-head attention, batched over heads (no per-head unroll) ---
    q = jnp.transpose(qkv_bf[:, :H].reshape(S, num_heads, hd), (1, 0, 2))
    k = jnp.transpose(qkv_bf[:, H:2 * H].reshape(S, num_heads, hd), (1, 0, 2))
    v = jnp.transpose(qkv_bf[:, 2 * H:].reshape(S, num_heads, hd), (1, 0, 2))

    s = jnp.einsum("hqd,hkd->hqk", q, k,
                   preferred_element_type=jnp.float32) * scale          # [nh,S,S] f32
    s = s - jnp.max(s, axis=-1, keepdims=True)
    p = jnp.exp(s)
    p = p * pl.reciprocal(jnp.sum(p, axis=-1, keepdims=True), approx=True)  # EUP slot
    ctx = jnp.einsum("hqk,hkd->hqd", p.astype(jnp.bfloat16), v,
                     preferred_element_type=jnp.float32)                 # [nh,S,hd] f32
    ctx = jnp.transpose(ctx, (1, 0, 2)).reshape(S, H)                    # [S, H] f32

    attn = jnp.dot(ctx.astype(jnp.bfloat16), wo_ref[0],
                   preferred_element_type=jnp.float32) + bo_ref[0]

    def layer_norm(y, g, b, eps=1e-12):
        mu = jnp.mean(y, axis=-1, keepdims=True)
        var = jnp.mean((y - mu) ** 2, axis=-1, keepdims=True)
        return (y - mu) * jax.lax.rsqrt(var + eps) * g + b

    h1 = layer_norm(xf + attn, ln1g_ref[0], ln1b_ref[0])                 # [S, H] f32

    # --- feed-forward (gelu output re-cast to bf16 before w2) ---
    f = jnp.dot(h1.astype(jnp.bfloat16), w1_ref[0],
                preferred_element_type=jnp.float32) + b1_ref[0]
    f = jax.nn.gelu(f)
    f = jnp.dot(f.astype(jnp.bfloat16), w2_ref[0],
                preferred_element_type=jnp.float32) + b2_ref[0]
    h2 = layer_norm(h1 + f, ln2g_ref[0], ln2b_ref[0])

    act_ref[...] = h2                                  # carry to next layer (VMEM only)

    # --- fused Linear(H, 2) + LogSoftmax head on the last layer step ---
    # Classifier weight is pre-padded to [H, 128] with pad bias = -1e30, so the
    # matmul is full-lane, the log-softmax ignores padded columns, and the store
    # is a single lane-dense [S, 128] block (no masked vst on a 2-wide output).
    @pl.when(layer == n_layers - 1)
    def _():
        logits = jnp.dot(h2, wc_ref[...],
                         preferred_element_type=jnp.float32) + bc_ref[...]
        m = jnp.max(logits, axis=-1, keepdims=True)
        lse = jnp.log(jnp.sum(jnp.exp(logits - m), axis=-1, keepdims=True)) + m
        cls_ref[0] = logits - lse


# ---------------------------------------------------------------------------
# Wrapper (glue)
# ---------------------------------------------------------------------------
def bert_binary_classification(token_ids, params):
    # Embedding gather stays in plain JAX; the whole encoder stack + head runs
    # in one pallas_call.
    x = params["tok_emb"][token_ids] + params["pos_emb"][: token_ids.shape[1]][None, :, :]
    x = x.astype(jnp.float32)
    B, S, H = x.shape
    layers = params["layers"]
    L = len(layers)
    num_heads = params["num_heads"]
    F = layers[0]["w1"].shape[-1]

    stk = lambda name, dt=jnp.float32: jnp.stack(
        [lp[name] for lp in layers], axis=0).astype(dt)

    wqkv = stk("wqkv", jnp.bfloat16); bqkv = stk("bqkv")
    wo = stk("wo", jnp.bfloat16);     bo = stk("bo")
    ln1g = stk("ln1g");               ln1b = stk("ln1b")
    w1 = stk("w1", jnp.bfloat16);     b1 = stk("b1")
    w2 = stk("w2", jnp.bfloat16);     b2 = stk("b2")
    ln2g = stk("ln2g");               ln2b = stk("ln2b")

    # Lane-dense padded classifier weight/bias (torch layout wc is [2, H]).
    wc_pad = jnp.zeros((H, _HEAD_LANES), jnp.float32).at[:, :2].set(params["wc"].T)
    bc_pad = jnp.full((1, _HEAD_LANES), _NEG_INF, jnp.float32).at[:, :2].set(params["bc"])

    weights = [wqkv, bqkv, wo, bo, ln1g, ln1b, w1, b1, w2, b2, ln2g, ln2b]

    def per_layer_spec(a):
        nd = a.ndim
        return pl.BlockSpec((1,) + a.shape[1:],
                            lambda b, l, _nd=nd: (l,) + (0,) * (_nd - 1))

    def const_spec(a):
        nd = a.ndim
        return pl.BlockSpec(a.shape, lambda b, l, _nd=nd: (0,) * _nd)

    flops_layer = 2 * S * H * 3 * H + 4 * S * S * H + 2 * S * H * H + 4 * S * H * F
    cost = pl.CostEstimate(
        flops=int(B * (L * flops_layer + 2 * S * H * _HEAD_LANES)),
        transcendentals=int(B * (L * (num_heads * S * S + S * F) + S * _HEAD_LANES)),
        bytes_accessed=int(sum(int(a.size) * a.dtype.itemsize
                               for a in [x, wc_pad, bc_pad] + weights)
                           + B * S * _HEAD_LANES * 4),
    )

    out = pl.pallas_call(
        partial(_bert_kernel, num_heads=num_heads),
        out_shape=jax.ShapeDtypeStruct((B, S, _HEAD_LANES), jnp.float32),
        grid=(B, L),
        in_specs=[pl.BlockSpec((1, S, H), lambda b, l: (b, 0, 0))]
                 + [per_layer_spec(w) for w in weights]
                 + [const_spec(wc_pad), const_spec(bc_pad)],
        out_specs=pl.BlockSpec((1, S, _HEAD_LANES), lambda b, l: (b, 0, 0)),
        scratch_shapes=[pltpu.VMEM((S, H), jnp.float32)],   # layer-resident activation
        compiler_params=pltpu.CompilerParams(
            dimension_semantics=("parallel", "arbitrary"),
            vmem_limit_bytes=_VMEM_LIMIT),
        cost_estimate=cost,
    )(x, *weights, wc_pad, bc_pad)

    return out[:, :, :2]                               # slice off lane padding


# ---------------------------------------------------------------------------
# Deterministic parameter init
# ---------------------------------------------------------------------------
def init_params(key, vocab, max_seq, d_model, num_heads, d_ff, num_layers):
    keys = jax.random.split(key, 4 + num_layers)

    def rnd(k, shape):
        return jax.random.normal(k, shape, jnp.float32) * 0.02

    params = {
        "num_heads": num_heads,
        "tok_emb": rnd(keys[0], (vocab, d_model)),
        "pos_emb": rnd(keys[1], (max_seq, d_model)),
        "wc": rnd(keys[2], (2, d_model)),      # torch Linear(d_model, 2) layout
        "bc": rnd(keys[3], (1, 2)),
        "layers": [],
    }
    for li in range(num_layers):
        lk = jax.random.split(keys[4 + li], 8)
        params["layers"].append({
            "wqkv": rnd(lk[0], (d_model, 3 * d_model)),   # fused, pre-transposed
            "bqkv": rnd(lk[1], (1, 3 * d_model)),
            "wo": rnd(lk[2], (d_model, d_model)),
            "bo": rnd(lk[3], (1, d_model)),
            "w1": rnd(lk[4], (d_model, d_ff)),
            "b1": rnd(lk[5], (1, d_ff)),
            "w2": rnd(lk[6], (d_ff, d_model)),
            "b2": rnd(lk[7], (1, d_model)),
            "ln1g": jnp.ones((1, d_model), jnp.float32),
            "ln1b": jnp.zeros((1, d_model), jnp.float32),
            "ln2g": jnp.ones((1, d_model), jnp.float32),
            "ln2b": jnp.zeros((1, d_model), jnp.float32),
        })
    return params


# ---------------------------------------------------------------------------
# Pure-JAX f32 reference (same math) for verification
# ---------------------------------------------------------------------------
def reference(token_ids, params):
    x = params["tok_emb"][token_ids] + params["pos_emb"][: token_ids.shape[1]][None, :, :]
    nh = params["num_heads"]
    for lp in params["layers"]:
        B, S, H = x.shape
        hd = H // nh
        qkv = x @ lp["wqkv"] + lp["bqkv"][0]
        q = qkv[..., :H].reshape(B, S, nh, hd).transpose(0, 2, 1, 3)
        k = qkv[..., H:2 * H].reshape(B, S, nh, hd).transpose(0, 2, 1, 3)
        v = qkv[..., 2 * H:].reshape(B, S, nh, hd).transpose(0, 2, 1, 3)
        s = jnp.einsum("bhqd,bhkd->bhqk", q, k) / math.sqrt(hd)
        p = jax.nn.softmax(s, axis=-1)
        o = jnp.einsum("bhqk,bhkd->bhqd", p, v).transpose(0, 2, 1, 3).reshape(B, S, H)
        attn = o @ lp["wo"] + lp["bo"][0]

        def ln(y, g, b, eps=1e-12):
            mu = y.mean(-1, keepdims=True)
            var = ((y - mu) ** 2).mean(-1, keepdims=True)
            return (y - mu) * jax.lax.rsqrt(var + eps) * g + b

        h1 = ln(x + attn, lp["ln1g"][0], lp["ln1b"][0])
        f = jax.nn.gelu(h1 @ lp["w1"] + lp["b1"][0])
        f = f @ lp["w2"] + lp["b2"][0]
        x = ln(h1 + f, lp["ln2g"][0], lp["ln2b"][0])
    logits = x @ params["wc"].T + params["bc"][0]
    return jax.nn.log_softmax(logits, axis=-1)


# ---------------------------------------------------------------------------
if __name__ == "__main__":
    B, S, H, NH, F, V, L = 2, 8, 32, 4, 64, 50, 2
    key = jax.random.PRNGKey(0)
    k_params, k_ids = jax.random.split(key)

    params = init_params(k_params, vocab=V, max_seq=S, d_model=H,
                         num_heads=NH, d_ff=F, num_layers=L)
    token_ids = jax.random.randint(k_ids, (B, S), 0, V, dtype=jnp.int32)

    out = bert_binary_classification(token_ids, params)
    out = jax.block_until_ready(out)

    assert out.shape == (B, S, 2), out.shape
    # log-softmax rows must exponentiate to probability distributions
    assert bool(jnp.allclose(jnp.exp(out).sum(-1), 1.0, atol=1e-3))
    ref = reference(token_ids, params)
    err = float(jnp.max(jnp.abs(out - ref)))
    assert err < 3e-2, err   # bf16 matmul path vs f32 reference

    print("KERNEL_OK")
</pallas_src>

<mosaic_0001>
module attributes {stable_mosaic.version = 11 : i64} {
  func.func @_bert_kernel(%arg0: i32, %arg1: i32, %arg2: memref<1x8x32xf32, #tpu.memory_space<vmem>>, %arg3: memref<1x32x96xbf16, #tpu.memory_space<vmem>>, %arg4: memref<1x1x96xf32, #tpu.memory_space<vmem>>, %arg5: memref<1x32x32xbf16, #tpu.memory_space<vmem>>, %arg6: memref<1x1x32xf32, #tpu.memory_space<vmem>>, %arg7: memref<1x1x32xf32, #tpu.memory_space<vmem>>, %arg8: memref<1x1x32xf32, #tpu.memory_space<vmem>>, %arg9: memref<1x32x64xbf16, #tpu.memory_space<vmem>>, %arg10: memref<1x1x64xf32, #tpu.memory_space<vmem>>, %arg11: memref<1x64x32xbf16, #tpu.memory_space<vmem>>, %arg12: memref<1x1x32xf32, #tpu.memory_space<vmem>>, %arg13: memref<1x1x32xf32, #tpu.memory_space<vmem>>, %arg14: memref<1x1x32xf32, #tpu.memory_space<vmem>>, %arg15: memref<32x128xf32, #tpu.memory_space<vmem>>, %arg16: memref<1x128xf32, #tpu.memory_space<vmem>>, %arg17: memref<1x8x128xf32, #tpu.memory_space<vmem>>, %arg18: memref<8x32xf32, #tpu.memory_space<vmem>>) attributes {dimension_semantics = [#tpu.dimension_semantics<parallel>, #tpu.dimension_semantics<arbitrary>], iteration_bounds = array<i64: 2, 2>, scalar_prefetch = 0 : i64, scratch_operands = 1 : i64, tpu.core_type = #tpu.core_type<tc>, window_params = [{transform_indices = @transform_0, window_bounds = array<i64: 1, 8, 32>}, {transform_indices = @transform_1, window_bounds = array<i64: 1, 32, 96>}, {transform_indices = @transform_2, window_bounds = array<i64: 1, 1, 96>}, {transform_indices = @transform_3, window_bounds = array<i64: 1, 32, 32>}, {transform_indices = @transform_4, window_bounds = array<i64: 1, 1, 32>}, {transform_indices = @transform_5, window_bounds = array<i64: 1, 1, 32>}, {transform_indices = @transform_6, window_bounds = array<i64: 1, 1, 32>}, {transform_indices = @transform_7, window_bounds = array<i64: 1, 32, 64>}, {transform_indices = @transform_8, window_bounds = array<i64: 1, 1, 64>}, {transform_indices = @transform_9, window_bounds = array<i64: 1, 64, 32>}, {transform_indices = @transform_10, window_bounds = array<i64: 1, 1, 32>}, {transform_indices = @transform_11, window_bounds = array<i64: 1, 1, 32>}, {transform_indices = @transform_12, window_bounds = array<i64: 1, 1, 32>}, {pipeline_mode = #tpu.pipeline_mode<synchronous>, transform_indices = @transform_13, window_bounds = array<i64: 32, 128>}, {pipeline_mode = #tpu.pipeline_mode<synchronous>, transform_indices = @transform_14, window_bounds = array<i64: 1, 128>}, {transform_indices = @transform_15, window_bounds = array<i64: 1, 8, 128>}]} {
    %c0_i32 = arith.constant 0 : i32
    %0 = arith.cmpi eq, %arg1, %c0_i32 : i32
    %1 = arith.extui %0 : i1 to i32
    %c0_i32_0 = arith.constant 0 : i32
    %2 = arith.cmpi ne, %1, %c0_i32_0 : i32
    scf.if %2 {
      %c0_63 = arith.constant 0 : index
      %c0_64 = arith.constant 0 : index
      %c0_65 = arith.constant 0 : index
      %134 = vector.load %arg2[%c0_63, %c0_64, %c0_65] : memref<1x8x32xf32, #tpu.memory_space<vmem>>, vector<1x8x32xf32>
      %135 = vector.shape_cast %134 : vector<1x8x32xf32> to vector<8x32xf32>
      %c0_66 = arith.constant 0 : index
      %c0_67 = arith.constant 0 : index
      %136 = vector.load %arg18[%c0_66, %c0_67] : memref<8x32xf32, #tpu.memory_space<vmem>>, vector<8x32xf32>
      tpu.vector_store %arg18[%c0_66, %c0_67], %135 {strides = array<i32>} : memref<8x32xf32, #tpu.memory_space<vmem>>, vector<8x32xf32>,
    } else {
    }
    %c0 = arith.constant 0 : index
    %c0_1 = arith.constant 0 : index
    %3 = vector.load %arg18[%c0, %c0_1] : memref<8x32xf32, #tpu.memory_space<vmem>>, vector<8x32xf32>
    %4 = arith.truncf %3 : vector<8x32xf32> to vector<8x32xbf16>
    %c0_2 = arith.constant 0 : index
    %c0_3 = arith.constant 0 : index
    %c0_4 = arith.constant 0 : index
    %5 = vector.load %arg3[%c0_2, %c0_3, %c0_4] : memref<1x32x96xbf16, #tpu.memory_space<vmem>>, vector<1x32x96xbf16>
    %6 = vector.shape_cast %5 : vector<1x32x96xbf16> to vector<32x96xbf16>
    %cst = arith.constant dense<0.000000e+00> : vector<8x96xf32>
    %7 = tpu.matmul %4, %6, %cst {dimension_numbers = #tpu.dot_dimension_numbers<[1], [0], [0], [1], [0, 0, 1, 1], [], []>} : vector<8x32xbf16>, vector<32x96xbf16>, vector<8x96xf32> -> vector<8x96xf32>
    %c0_5 = arith.constant 0 : index
    %c0_6 = arith.constant 0 : index
    %c0_7 = arith.constant 0 : index
    %8 = vector.load %arg4[%c0_5, %c0_6, %c0_7] : memref<1x1x96xf32, #tpu.memory_space<vmem>>, vector<1x1x96xf32>
    %9 = vector.shape_cast %8 : vector<1x1x96xf32> to vector<1x96xf32>
    %10 = vector.broadcast %9 : vector<1x96xf32> to vector<8x96xf32>
    %11 = arith.addf %7, %10 : vector<8x96xf32>
    %12 = arith.truncf %11 : vector<8x96xf32> to vector<8x96xbf16>
    %13 = vector.extract_strided_slice %12 {offsets = [0, 0], sizes = [8, 32], strides = [1, 1]} : vector<8x96xbf16> to vector<8x32xbf16>
    %14 = vector.shape_cast %13 : vector<8x32xbf16> to vector<8x4x8xbf16>
    %15 = tpu.transpose %14, [1, 0, 2] : vector<8x4x8xbf16> -> vector<4x8x8xbf16>
    %16 = vector.extract_strided_slice %12 {offsets = [0, 32], sizes = [8, 32], strides = [1, 1]} : vector<8x96xbf16> to vector<8x32xbf16>
    %17 = vector.shape_cast %16 : vector<8x32xbf16> to vector<8x4x8xbf16>
    %18 = tpu.transpose %17, [1, 0, 2] : vector<8x4x8xbf16> -> vector<4x8x8xbf16>
    %19 = vector.extract_strided_slice %12 {offsets = [0, 64], sizes = [8, 32], strides = [1, 1]} : vector<8x96xbf16> to vector<8x32xbf16>
    %20 = vector.shape_cast %19 : vector<8x32xbf16> to vector<8x4x8xbf16>
    %21 = tpu.transpose %20, [1, 0, 2] : vector<8x4x8xbf16> -> vector<4x8x8xbf16>
    "tpu.trace_start"() <{level = 10 : i32, message = "hqd,hkd->hqk"}> : () -> ()
    %cst_8 = arith.constant dense<0.000000e+00> : vector<4x8x8xf32>
    %22 = tpu.matmul %15, %18, %cst_8 {dimension_numbers = #tpu.dot_dimension_numbers<[2], [2], [1], [1], [0, 0, 0, 1, 1, 1], [0], [0]>} : vector<4x8x8xbf16>, vector<4x8x8xbf16>, vector<4x8x8xf32> -> vector<4x8x8xf32>
    "tpu.trace_stop"() : () -> ()
    %cst_9 = arith.constant 0.353553385 : f32
    %23 = vector.broadcast %cst_9 : f32 to vector<4x8x8xf32>
    %24 = arith.mulf %22, %23 : vector<4x8x8xf32>
    %cst_10 = arith.constant dense<0xFF800000> : vector<4x8xf32>
    %25 = vector.multi_reduction <maximumf>, %24, %cst_10 [2] : vector<4x8x8xf32> to vector<4x8xf32>
    %26 = vector.shape_cast %25 : vector<4x8xf32> to vector<4x8x1xf32>
    %27 = vector.broadcast %26 : vector<4x8x1xf32> to vector<4x8x8xf32>
    %28 = arith.subf %24, %27 : vector<4x8x8xf32>
    %29 = math.exp %28 : vector<4x8x8xf32>
    %cst_11 = arith.constant dense<0.000000e+00> : vector<4x8xf32>
    %30 = vector.multi_reduction <add>, %29, %cst_11 [2] : vector<4x8x8xf32> to vector<4x8xf32>
    %31 = vector.shape_cast %30 : vector<4x8xf32> to vector<4x8x1xf32>
    %32 = tpu.reciprocal %31 {approx = true} : vector<4x8x1xf32> -> vector<4x8x1xf32>
    %33 = vector.broadcast %32 : vector<4x8x1xf32> to vector<4x8x8xf32>
    %34 = arith.mulf %29, %33 : vector<4x8x8xf32>
    %35 = arith.truncf %34 : vector<4x8x8xf32> to vector<4x8x8xbf16>
    "tpu.trace_start"() <{level = 10 : i32, message = "hqk,hkd->hqd"}> : () -> ()
    %cst_12 = arith.constant dense<0.000000e+00> : vector<4x8x8xf32>
    %36 = tpu.matmul %35, %21, %cst_12 {dimension_numbers = #tpu.dot_dimension_numbers<[2], [1], [1], [2], [0, 0, 0, 1, 1, 2], [0], [0]>} : vector<4x8x8xbf16>, vector<4x8x8xbf16>, vector<4x8x8xf32> -> vector<4x8x8xf32>
    "tpu.trace_stop"() : () -> ()
    %37 = tpu.transpose %36, [1, 0, 2] : vector<4x8x8xf32> -> vector<8x4x8xf32>
    %38 = vector.shape_cast %37 : vector<8x4x8xf32> to vector<8x32xf32>
    %39 = arith.truncf %38 : vector<8x32xf32> to vector<8x32xbf16>
    %c0_13 = arith.constant 0 : index
    %c0_14 = arith.constant 0 : index
    %c0_15 = arith.constant 0 : index
    %40 = vector.load %arg5[%c0_13, %c0_14, %c0_15] : memref<1x32x32xbf16, #tpu.memory_space<vmem>>, vector<1x32x32xbf16>
    %41 = vector.shape_cast %40 : vector<1x32x32xbf16> to vector<32x32xbf16>
    %cst_16 = arith.constant dense<0.000000e+00> : vector<8x32xf32>
    %42 = tpu.matmul %39, %41, %cst_16 {dimension_numbers = #tpu.dot_dimension_numbers<[1], [0], [0], [1], [0, 0, 1, 1], [], []>} : vector<8x32xbf16>, vector<32x32xbf16>, vector<8x32xf32> -> vector<8x32xf32>
    %c0_17 = arith.constant 0 : index
    %c0_18 = arith.constant 0 : index
    %c0_19 = arith.constant 0 : index
    %43 = vector.load %arg6[%c0_17, %c0_18, %c0_19] : memref<1x1x32xf32, #tpu.memory_space<vmem>>, vector<1x1x32xf32>
    %44 = vector.shape_cast %43 : vector<1x1x32xf32> to vector<1x32xf32>
    %45 = vector.broadcast %44 : vector<1x32xf32> to vector<8x32xf32>
    %46 = arith.addf %42, %45 : vector<8x32xf32>
    %47 = arith.addf %3, %46 : vector<8x32xf32>
    %c0_20 = arith.constant 0 : index
    %c0_21 = arith.constant 0 : index
    %c0_22 = arith.constant 0 : index
    %48 = vector.load %arg7[%c0_20, %c0_21, %c0_22] : memref<1x1x32xf32, #tpu.memory_space<vmem>>, vector<1x1x32xf32>
    %49 = vector.shape_cast %48 : vector<1x1x32xf32> to vector<1x32xf32>
    %c0_23 = arith.constant 0 : index
    %c0_24 = arith.constant 0 : index
    %c0_25 = arith.constant 0 : index
    %50 = vector.load %arg8[%c0_23, %c0_24, %c0_25] : memref<1x1x32xf32, #tpu.memory_space<vmem>>, vector<1x1x32xf32>
    %51 = vector.shape_cast %50 : vector<1x1x32xf32> to vector<1x32xf32>
    %cst_26 = arith.constant dense<0.000000e+00> : vector<8xf32>
    %52 = vector.multi_reduction <add>, %47, %cst_26 [1] : vector<8x32xf32> to vector<8xf32>
    %53 = vector.shape_cast %52 : vector<8xf32> to vector<8x1xf32>
    %cst_27 = arith.constant 3.200000e+01 : f32
    %54 = vector.broadcast %cst_27 : f32 to vector<8x1xf32>
    %55 = arith.divf %53, %54 : vector<8x1xf32>
    %56 = vector.broadcast %55 : vector<8x1xf32> to vector<8x32xf32>
    %57 = arith.subf %47, %56 : vector<8x32xf32>
    %58 = arith.mulf %57, %57 : vector<8x32xf32>
    %cst_28 = arith.constant dense<0.000000e+00> : vector<8xf32>
    %59 = vector.multi_reduction <add>, %58, %cst_28 [1] : vector<8x32xf32> to vector<8xf32>
    %60 = vector.shape_cast %59 : vector<8xf32> to vector<8x1xf32>
    %cst_29 = arith.constant 3.200000e+01 : f32
    %61 = vector.broadcast %cst_29 : f32 to vector<8x1xf32>
    %62 = arith.divf %60, %61 : vector<8x1xf32>
    %63 = vector.broadcast %55 : vector<8x1xf32> to vector<8x32xf32>
    %64 = arith.subf %47, %63 : vector<8x32xf32>
    %cst_30 = arith.constant 9.99999996E-13 : f32
    %65 = vector.broadcast %cst_30 : f32 to vector<8x1xf32>
    %66 = arith.addf %62, %65 : vector<8x1xf32>
    %67 = math.rsqrt %66 : vector<8x1xf32>
    %68 = vector.broadcast %67 : vector<8x1xf32> to vector<8x32xf32>
    %69 = arith.mulf %64, %68 : vector<8x32xf32>
    %70 = vector.broadcast %49 : vector<1x32xf32> to vector<8x32xf32>
    %71 = arith.mulf %69, %70 : vector<8x32xf32>
    %72 = vector.broadcast %51 : vector<1x32xf32> to vector<8x32xf32>
    %73 = arith.addf %71, %72 : vector<8x32xf32>
    %74 = arith.truncf %73 : vector<8x32xf32> to vector<8x32xbf16>
    %c0_31 = arith.constant 0 : index
    %c0_32 = arith.constant 0 : index
    %c0_33 = arith.constant 0 : index
    %75 = vector.load %arg9[%c0_31, %c0_32, %c0_33] : memref<1x32x64xbf16, #tpu.memory_space<vmem>>, vector<1x32x64xbf16>
    %76 = vector.shape_cast %75 : vector<1x32x64xbf16> to vector<32x64xbf16>
    %cst_34 = arith.constant dense<0.000000e+00> : vector<8x64xf32>
    %77 = tpu.matmul %74, %76, %cst_34 {dimension_numbers = #tpu.dot_dimension_numbers<[1], [0], [0], [1], [0, 0, 1, 1], [], []>} : vector<8x32xbf16>, vector<32x64xbf16>, vector<8x64xf32> -> vector<8x64xf32>
    %c0_35 = arith.constant 0 : index
    %c0_36 = arith.constant 0 : index
    %c0_37 = arith.constant 0 : index
    %78 = vector.load %arg10[%c0_35, %c0_36, %c0_37] : memref<1x1x64xf32, #tpu.memory_space<vmem>>, vector<1x1x64xf32>
    %79 = vector.shape_cast %78 : vector<1x1x64xf32> to vector<1x64xf32>
    %80 = vector.broadcast %79 : vector<1x64xf32> to vector<8x64xf32>
    %81 = arith.addf %77, %80 : vector<8x64xf32>
    %82 = arith.mulf %81, %81 : vector<8x64xf32>
    %83 = arith.mulf %81, %82 : vector<8x64xf32>
    %cst_38 = arith.constant 4.471500e-02 : f32
    %84 = vector.broadcast %cst_38 : f32 to vector<8x64xf32>
    %85 = arith.mulf %84, %83 : vector<8x64xf32>
    %86 = arith.addf %81, %85 : vector<8x64xf32>
    %cst_39 = arith.constant 0.797884583 : f32
    %87 = vector.broadcast %cst_39 : f32 to vector<8x64xf32>
    %88 = arith.mulf %87, %86 : vector<8x64xf32>
    %89 = math.tanh %88 : vector<8x64xf32>
    %cst_40 = arith.constant 1.000000e+00 : f32
    %90 = vector.broadcast %cst_40 : f32 to vector<8x64xf32>
    %91 = arith.addf %90, %89 : vector<8x64xf32>
    %cst_41 = arith.constant 5.000000e-01 : f32
    %92 = vector.broadcast %cst_41 : f32 to vector<8x64xf32>
    %93 = arith.mulf %92, %91 : vector<8x64xf32>
    %94 = arith.mulf %81, %93 : vector<8x64xf32>
    %95 = arith.truncf %94 : vector<8x64xf32> to vector<8x64xbf16>
    %c0_42 = arith.constant 0 : index
    %c0_43 = arith.constant 0 : index
    %c0_44 = arith.constant 0 : index
    %96 = vector.load %arg11[%c0_42, %c0_43, %c0_44] : memref<1x64x32xbf16, #tpu.memory_space<vmem>>, vector<1x64x32xbf16>
    %97 = vector.shape_cast %96 : vector<1x64x32xbf16> to vector<64x32xbf16>
    %cst_45 = arith.constant dense<0.000000e+00> : vector<8x32xf32>
    %98 = tpu.matmul %95, %97, %cst_45 {dimension_numbers = #tpu.dot_dimension_numbers<[1], [0], [0], [1], [0, 0, 1, 1], [], []>} : vector<8x64xbf16>, vector<64x32xbf16>, vector<8x32xf32> -> vector<8x32xf32>
    %c0_46 = arith.constant 0 : index
    %c0_47 = arith.constant 0 : index
    %c0_48 = arith.constant 0 : index
    %99 = vector.load %arg12[%c0_46, %c0_47, %c0_48] : memref<1x1x32xf32, #tpu.memory_space<vmem>>, vector<1x1x32xf32>
    %100 = vector.shape_cast %99 : vector<1x1x32xf32> to vector<1x32xf32>
    %101 = vector.broadcast %100 : vector<1x32xf32> to vector<8x32xf32>
    %102 = arith.addf %98, %101 : vector<8x32xf32>
    %103 = arith.addf %73, %102 : vector<8x32xf32>
    %c0_49 = arith.constant 0 : index
    %c0_50 = arith.constant 0 : index
    %c0_51 = arith.constant 0 : index
    %104 = vector.load %arg13[%c0_49, %c0_50, %c0_51] : memref<1x1x32xf32, #tpu.memory_space<vmem>>, vector<1x1x32xf32>
    %105 = vector.shape_cast %104 : vector<1x1x32xf32> to vector<1x32xf32>
    %c0_52 = arith.constant 0 : index
    %c0_53 = arith.constant 0 : index
    %c0_54 = arith.constant 0 : index
    %106 = vector.load %arg14[%c0_52, %c0_53, %c0_54] : memref<1x1x32xf32, #tpu.memory_space<vmem>>, vector<1x1x32xf32>
    %107 = vector.shape_cast %106 : vector<1x1x32xf32> to vector<1x32xf32>
    %cst_55 = arith.constant dense<0.000000e+00> : vector<8xf32>
    %108 = vector.multi_reduction <add>, %103, %cst_55 [1] : vector<8x32xf32> to vector<8xf32>
    %109 = vector.shape_cast %108 : vector<8xf32> to vector<8x1xf32>
    %cst_56 = arith.constant 3.200000e+01 : f32
    %110 = vector.broadcast %cst_56 : f32 to vector<8x1xf32>
    %111 = arith.divf %109, %110 : vector<8x1xf32>
    %112 = vector.broadcast %111 : vector<8x1xf32> to vector<8x32xf32>
    %113 = arith.subf %103, %112 : vector<8x32xf32>
    %114 = arith.mulf %113, %113 : vector<8x32xf32>
    %cst_57 = arith.constant dense<0.000000e+00> : vector<8xf32>
    %115 = vector.multi_reduction <add>, %114, %cst_57 [1] : vector<8x32xf32> to vector<8xf32>
    %116 = vector.shape_cast %115 : vector<8xf32> to vector<8x1xf32>
    %cst_58 = arith.constant 3.200000e+01 : f32
    %117 = vector.broadcast %cst_58 : f32 to vector<8x1xf32>
    %118 = arith.divf %116, %117 : vector<8x1xf32>
    %119 = vector.broadcast %111 : vector<8x1xf32> to vector<8x32xf32>
    %120 = arith.subf %103, %119 : vector<8x32xf32>
    %cst_59 = arith.constant 9.99999996E-13 : f32
    %121 = vector.broadcast %cst_59 : f32 to vector<8x1xf32>
    %122 = arith.addf %118, %121 : vector<8x1xf32>
    %123 = math.rsqrt %122 : vector<8x1xf32>
    %124 = vector.broadcast %123 : vector<8x1xf32> to vector<8x32xf32>
    %125 = arith.mulf %120, %124 : vector<8x32xf32>
    %126 = vector.broadcast %105 : vector<1x32xf32> to vector<8x32xf32>
    %127 = arith.mulf %125, %126 : vector<8x32xf32>
    %128 = vector.broadcast %107 : vector<1x32xf32> to vector<8x32xf32>
    %129 = arith.addf %127, %128 : vector<8x32xf32>
    %c0_60 = arith.constant 0 : index
    %c0_61 = arith.constant 0 : index
    %130 = vector.load %arg18[%c0_60, %c0_61] : memref<8x32xf32, #tpu.memory_space<vmem>>, vector<8x32xf32>
    tpu.vector_store %arg18[%c0_60, %c0_61], %129 {strides = array<i32>} : memref<8x32xf32, #tpu.memory_space<vmem>>, vector<8x32xf32>,
    %c1_i32 = arith.constant 1 : i32
    %131 = arith.cmpi eq, %arg1, %c1_i32 : i32
    %132 = arith.extui %131 : i1 to i32
    %c0_i32_62 = arith.constant 0 : i32
    %133 = arith.cmpi ne, %132, %c0_i32_62 : i32
    scf.if %133 {
      %c0_63 = arith.constant 0 : index
      %c0_64 = arith.constant 0 : index
      %134 = vector.load %arg15[%c0_63, %c0_64] : memref<32x128xf32, #tpu.memory_space<vmem>>, vector<32x128xf32>
      %cst_65 = arith.constant dense<0.000000e+00> : vector<8x128xf32>
      %135 = tpu.matmul %129, %134, %cst_65 {dimension_numbers = #tpu.dot_dimension_numbers<[1], [0], [0], [1], [0, 0, 1, 1], [], []>} : vector<8x32xf32>, vector<32x128xf32>, vector<8x128xf32> -> vector<8x128xf32>
      %c0_66 = arith.constant 0 : index
      %c0_67 = arith.constant 0 : index
      %136 = vector.load %arg16[%c0_66, %c0_67] : memref<1x128xf32, #tpu.memory_space<vmem>>, vector<1x128xf32>
      %137 = vector.broadcast %136 : vector<1x128xf32> to vector<8x128xf32>
      %138 = arith.addf %135, %137 : vector<8x128xf32>
      %cst_68 = arith.constant dense<0xFF800000> : vector<8xf32>
      %139 = vector.multi_reduction <maximumf>, %138, %cst_68 [1] : vector<8x128xf32> to vector<8xf32>
      %140 = vector.shape_cast %139 : vector<8xf32> to vector<8x1xf32>
      %141 = vector.broadcast %140 : vector<8x1xf32> to vector<8x128xf32>
      %142 = arith.subf %138, %141 : vector<8x128xf32>
      %143 = math.exp %142 : vector<8x128xf32>
      %cst_69 = arith.constant dense<0.000000e+00> : vector<8xf32>
      %144 = vector.multi_reduction <add>, %143, %cst_69 [1] : vector<8x128xf32> to vector<8xf32>
      %145 = vector.shape_cast %144 : vector<8xf32> to vector<8x1xf32>
      %146 = math.log %145 : vector<8x1xf32>
      %147 = arith.addf %146, %140 : vector<8x1xf32>
      %148 = vector.broadcast %147 : vector<8x1xf32> to vector<8x128xf32>
      %149 = arith.subf %138, %148 : vector<8x128xf32>
      %c0_70 = arith.constant 0 : index
      %c0_71 = arith.constant 0 : index
      %c0_72 = arith.constant 0 : index
      %150 = vector.load %arg17[%c0_70, %c0_71, %c0_72] : memref<1x8x128xf32, #tpu.memory_space<vmem>>, vector<1x8x128xf32>
      %151 = vector.shape_cast %150 : vector<1x8x128xf32> to vector<8x128xf32>
      %152 = vector.shape_cast %149 : vector<8x128xf32> to vector<1x8x128xf32>
      tpu.vector_store %arg17[%c0_70, %c0_71, %c0_72], %152 {strides = array<i32>} : memref<1x8x128xf32, #tpu.memory_space<vmem>>, vector<1x8x128xf32>,
    } else {
    }
    return
  }
  func.func @transform_0(%arg0: i32, %arg1: i32) -> (i32, i32, i32) {
    %c0_i32 = arith.constant 0 : i32
    %c0_i32_0 = arith.constant 0 : i32
    %c0_i32_1 = arith.constant 0 : i32
    return %arg0, %c0_i32, %c0_i32_0 : i32, i32, i32
  }
  func.func @transform_1(%arg0: i32, %arg1: i32) -> (i32, i32, i32) {
    %c0_i32 = arith.constant 0 : i32
    %c0_i32_0 = arith.constant 0 : i32
    %c0_i32_1 = arith.constant 0 : i32
    return %arg1, %c0_i32, %c0_i32_0 : i32, i32, i32
  }
  func.func @transform_2(%arg0: i32, %arg1: i32) -> (i32, i32, i32) {
    %c0_i32 = arith.constant 0 : i32
    %c0_i32_0 = arith.constant 0 : i32
    %c0_i32_1 = arith.constant 0 : i32
    return %arg1, %c0_i32, %c0_i32_0 : i32, i32, i32
  }
  func.func @transform_3(%arg0: i32, %arg1: i32) -> (i32, i32, i32) {
    %c0_i32 = arith.constant 0 : i32
    %c0_i32_0 = arith.constant 0 : i32
    %c0_i32_1 = arith.constant 0 : i32
    return %arg1, %c0_i32, %c0_i32_0 : i32, i32, i32
  }
  func.func @transform_4(%arg0: i32, %arg1: i32) -> (i32, i32, i32) {
    %c0_i32 = arith.constant 0 : i32
    %c0_i32_0 = arith.constant 0 : i32
    %c0_i32_1 = arith.constant 0 : i32
    return %arg1, %c0_i32, %c0_i32_0 : i32, i32, i32
  }
  func.func @transform_5(%arg0: i32, %arg1: i32) -> (i32, i32, i32) {
    %c0_i32 = arith.constant 0 : i32
    %c0_i32_0 = arith.constant 0 : i32
    %c0_i32_1 = arith.constant 0 : i32
    return %arg1, %c0_i32, %c0_i32_0 : i32, i32, i32
  }
  func.func @transform_6(%arg0: i32, %arg1: i32) -> (i32, i32, i32) {
    %c0_i32 = arith.constant 0 : i32
    %c0_i32_0 = arith.constant 0 : i32
    %c0_i32_1 = arith.constant 0 : i32
    return %arg1, %c0_i32, %c0_i32_0 : i32, i32, i32
  }
  func.func @transform_7(%arg0: i32, %arg1: i32) -> (i32, i32, i32) {
    %c0_i32 = arith.constant 0 : i32
    %c0_i32_0 = arith.constant 0 : i32
    %c0_i32_1 = arith.constant 0 : i32
    return %arg1, %c0_i32, %c0_i32_0 : i32, i32, i32
  }
  func.func @transform_8(%arg0: i32, %arg1: i32) -> (i32, i32, i32) {
    %c0_i32 = arith.constant 0 : i32
    %c0_i32_0 = arith.constant 0 : i32
    %c0_i32_1 = arith.constant 0 : i32
    return %arg1, %c0_i32, %c0_i32_0 : i32, i32, i32
  }
  func.func @transform_9(%arg0: i32, %arg1: i32) -> (i32, i32, i32) {
    %c0_i32 = arith.constant 0 : i32
    %c0_i32_0 = arith.constant 0 : i32
    %c0_i32_1 = arith.constant 0 : i32
    return %arg1, %c0_i32, %c0_i32_0 : i32, i32, i32
  }
  func.func @transform_10(%arg0: i32, %arg1: i32) -> (i32, i32, i32) {
    %c0_i32 = arith.constant 0 : i32
    %c0_i32_0 = arith.constant 0 : i32
    %c0_i32_1 = arith.constant 0 : i32
    return %arg1, %c0_i32, %c0_i32_0 : i32, i32, i32
  }
  func.func @transform_11(%arg0: i32, %arg1: i32) -> (i32, i32, i32) {
    %c0_i32 = arith.constant 0 : i32
    %c0_i32_0 = arith.constant 0 : i32
    %c0_i32_1 = arith.constant 0 : i32
    return %arg1, %c0_i32, %c0_i32_0 : i32, i32, i32
  }
  func.func @transform_12(%arg0: i32, %arg1: i32) -> (i32, i32, i32) {
    %c0_i32 = arith.constant 0 : i32
    %c0_i32_0 = arith.constant 0 : i32
    %c0_i32_1 = arith.constant 0 : i32
    return %arg1, %c0_i32, %c0_i32_0 : i32, i32, i32
  }
  func.func @transform_13(%arg0: i32, %arg1: i32) -> (i32, i32) {
    %c0_i32 = arith.constant 0 : i32
    %c0_i32_0 = arith.constant 0 : i32
    %c0_i32_1 = arith.constant 0 : i32
    return %c0_i32, %c0_i32_0 : i32, i32
  }
  func.func @transform_14(%arg0: i32, %arg1: i32) -> (i32, i32) {
    %c0_i32 = arith.constant 0 : i32
    %c0_i32_0 = arith.constant 0 : i32
    %c0_i32_1 = arith.constant 0 : i32
    return %c0_i32, %c0_i32_0 : i32, i32
  }
  func.func @transform_15(%arg0: i32, %arg1: i32) -> (i32, i32, i32) {
    %c0_i32 = arith.constant 0 : i32
    %c0_i32_0 = arith.constant 0 : i32
    %c0_i32_1 = arith.constant 0 : i32
    return %arg0, %c0_i32, %c0_i32_0 : i32, i32, i32
  }
}

</mosaic_0001>

<bundles_post_ra>
// kernel: tpu_custom_call.1
= control target key start
LH: loop header
LB: loop body
LE: loop exit
PB: predicated region body
PF: predicated region fallthrough
CT: control target
= control target key end

     0   :  { %s3292_s0 = inlined_call_operand.hbm [shape: f32[2,8,32], index: 0, kind: input, shape index: {}]   ;;  %s3293_s1 = inlined_call_operand.vmem [shape: bf16[2,32,96], index: 1, kind: input, shape index: {}]   ;;  %s3294_s2 = inlined_call_operand.hbm [shape: f32[2,1,96], index: 2, kind: input, shape index: {}]   ;;  %s3295_s3 = inlined_call_operand.vmem [shape: bf16[2,32,32], index: 3, kind: input, shape index: {}]   ;;  %s3296_s4 = inlined_call_operand.vmem [shape: f32[2,1,32], index: 4, kind: input, shape index: {}]   ;;  %s3297_s5 = inlined_call_operand.hbm [shape: f32[2,1,32], index: 5, kind: input, shape index: {}]   ;;  %s3298_s6 = inlined_call_operand.vmem [shape: f32[2,1,32], index: 6, kind: input, shape index: {}]   ;;  %s3299_s7 = inlined_call_operand.vmem [shape: bf16[2,32,64], index: 7, kind: input, shape index: {}]   ;;  %s3300_s8 = inlined_call_operand.vmem [shape: f32[2,1,64], index: 8, kind: input, shape index: {}]   ;;  %s3301_s9 = inlined_call_operand.vmem [shape: bf16[2,64,32], index: 9, kind: input, shape index: {}]   ;;  %s3302_s10 = inlined_call_operand.vmem [shape: f32[2,1,32], index: 10, kind: input, shape index: {}]   ;;  %s3303_s11 = inlined_call_operand.hbm [shape: f32[2,1,32], index: 11, kind: input, shape index: {}]   ;;  %s3304_s12 = inlined_call_operand.vmem [shape: f32[2,1,32], index: 12, kind: input, shape index: {}]   ;;  %s3305_s13 = inlined_call_operand.hbm [shape: f32[32,128], index: 13, kind: input, shape index: {}]   ;;  %s3306_s14 = inlined_call_operand.vmem [shape: f32[1,128], index: 14, kind: input, shape index: {}]   ;;  %s3307_s15 = inlined_call_operand.hbm [shape: f32[2,8,128], index: 15, kind: output, shape index: {}]  }
   0x1   :  { %3321 = sst [smem:[#allocation30_spill]] %s3292_s0 }
   0x2   :  { %3322 = sst [smem:[#allocation31_spill]] %s3293_s1 }
   0x3   :  { %3323 = sst [smem:[#allocation32_spill]] %s3294_s2 }
   0x4   :  { %3324 = sst [smem:[#allocation33_spill]] %s3295_s3 }
   0x5   :  { %3325 = sst [smem:[#allocation34_spill]] %s3296_s4 }
   0x6   :  { %3326 = sst [smem:[#allocation35_spill]] %s3297_s5 }
   0x7   :  { %3327 = sst [smem:[#allocation36_spill]] %s3298_s6 }
   0x8   :  { %3328 = sst [smem:[#allocation37_spill]] %s3299_s7 }
   0x9   :  { %3329 = sst [smem:[#allocation38_spill]] %s3300_s8 }
   0xa   :  { %3330 = sst [smem:[#allocation39_spill]] %s3301_s9 }
   0xb   :  { %3331 = sst [smem:[#allocation40_spill]] %s3302_s10 }
   0xc   :  { %3332 = sst [smem:[#allocation41_spill]] %s3303_s11 }
   0xd   :  { %3333 = sst [smem:[#allocation42_spill]] %s3304_s12 }
   0xe   :  { %3334 = sst [smem:[#allocation43_spill]] %s3305_s13 }
   0xf   :  { %3335 = sst [smem:[#allocation44_spill]] %s3306_s14 }
  0x10   :  { %3336 = sst [smem:[#allocation45_spill]] %s3307_s15 }
  0x11   :  { %20 = vsyncpa [#allocation4], 0 }
  0x12   :  { %22 = vsyncpa [#allocation4 + $0x1], 0 }
  0x13   :  { %23 = vsyncpa [#allocation7], 0 }
  0x14   :  { %25 = vsyncpa [#allocation7 + $0x1], 0 }
  0x15   :  { %26 = vsyncpa [#allocation10], 0 }
  0x16   :  { %28 = vsyncpa [#allocation10 + $0x1], 0 }
  0x17   :  { %29 = vsyncpa [#allocation5], 0 }
  0x18   :  { %31 = vsyncpa [#allocation5 + $0x1], 0  ;;  %s2701_s18 = smov 0   ;;  %s2703_s19 = smov 0  }
  0x19   :  { %s2705_s20 = smov 0   ;;  %s2707_s21 = smov 0  }
  0x1a   :  { %s2709_s22 = smov 0   ;;  %s2711_s23 = smov 0  }
  0x1b   :  { %s2713_s24 = smov 0   ;;  %s2715_s25 = smov 0  }
  0x1c   :  { %s2717_s26 = smov 0   ;;  %s2719_s27 = smov 0  }
  0x1d   :  { %s2721_s28 = smov 0  }
  0x1e LB: > { %3337 = sst [smem:[#allocation18_spill]] %s2573_s20  ;;  %s2757_s29 = sadd.s32 4294967295, %s2605_s28   ;;  %s2605_s28 = sphi %s2721_s28, %s37_s28   ;;  %s2601_s27 = sphi %s2719_s27, %s3398_s27   ;;  %s2597_s26 = sphi %s2717_s26, %s3397_s26   ;;  %s2593_s25 = sphi %s2715_s25, %s3396_s25   ;;  %s2589_s24 = sphi %s2713_s24, %s3395_s24   ;;  %s2585_s23 = sphi %s2711_s23, %s3394_s23   ;;  %s2581_s22 = sphi %s2709_s22, %s3393_s22   ;;  %s2577_s21 = sphi %s2707_s21, %s3392_s21   ;;  %s2573_s20 = sphi %s2705_s20, %s3391_s20   ;;  %s2569_s19 = sphi %s2703_s19, %s3400_s19   ;;  %s2565_s18 = sphi %s2701_s18, %s3399_s18  }
  0x1f   : > { %3338 = sst [smem:[#allocation19_spill]] %s2577_s21  ;;  %p2053_p0 = scmp.ge.s32.totalorder %s2605_s28, 1 }
  0x20   : > { %3339 = sst [smem:[#allocation20_spill]] %s2581_s22  ;;  %p70_p1 = scmp.eq.s32.totalorder %s2757_s29, 0 }
  0x21   : > { %3340 = sst [smem:[#allocation21_spill]] %s2585_s23  ;;  %p460_p2 = scmp.lt.s32.totalorder %s2605_s28, 5 }
  0x22   : > { %3341 = sst [smem:[#allocation22_spill]] %s2593_s25  ;;  %s2607_s25 = smov [#allocation11]  }
  0x23   : > { %3342 = sst [smem:[#allocation23_spill]] %s2597_s26  ;;  %p2765_p3 = pnand %p2053_p0, %p460_p2 }
  0x24   : > { %3343 = sst [smem:[#allocation24_spill]] %s2601_s27  ;;  %s473_s14 = sshll.u32 %s2607_s25, 4  ;;  %s474_s14 = int_to_ptr.vmem [resolvable:$true] %s473_s14 }
  0x25   : > { %s3344_s13 = sld [smem:[#allocation43_spill]]  ;;  %p2157_p4 = pneg %p2765_p3 }
  0x26   : > { %s2608_s30 = smov 128   ;;  %s2609_s16 = smov 8  }
  0x27   : > { %p2158_p5 = pnand %p2157_p4, %p70_p1  ;;  %p64_p7 = scmp.eq.s32.totalorder %s2605_s28, 0 }
  0x28   : > { %s108_s10 = sadd.s32 1, %s2573_s20  ;;  %p115_p8 = scmp.ne.s32.totalorder %s2573_s20, %s2569_s19 }
  0x29   : > { %p121_p10 = scmp.ne.s32.totalorder %s2569_s19, %s2565_s18  ;;  %p2179_p11 = scmp.lt.s32.totalorder %s2605_s28, 4 }
  0x2a   : > { %p2788_p9 = por %p115_p8, %p64_p7  ;;  %s3351_s2 = sld [smem:[#allocation32_spill]] }
  0x2b   : > { %s471_s17 = sshll.u32 %s3344_s13, 4  ;;  %s46_s13 = sadd.s32 1, %s2597_s26  ;;  %s472_s17 = int_to_ptr.hbm [resolvable:$true] %s471_s17 }
  0x2c   : > { %2160 = dma.hbm_to_vmem [thread:$0]  (!%p2158_p5), %s472_s17, 512, %s474_s14, [#allocation10], %s2608_s30, %s2608_s30, %s2609_s16  }
  0x2d   : > { %p2774_p6 = scmp.ge.s32.totalorder %s46_s13, 2  ;;  %p2799_p13 = por %p121_p10, %p70_p1 }
  0x2e   : > { %s3310_s30 = sand.u32 1, %s2605_s28   ;;  %s2805_s16 = sand.u32 1, %s2573_s20  }
  0x2f   : > { %s3402_s13 = smov (%p2774_p6, %s46_s13), 0  ;;  %s520_s8 = scalar_lea.vmem [#allocation6], %s2805_s16 }
  0x30   : > { %3347 = sst [smem:[#allocation25_spill]] %s3402_s13  ;;  %s105_s14 = ssub.s32 %s2597_s26, %s3402_s13 }
  0x31   : > { %p106_p12 = scmp.eq.s32.totalorder %s105_s14, 0  ;;  %s523_s14 = scalar_lea.hbm %s3351_s2, %s2597_s26 }
  0x32   : > { %s527_s7 = sshll.u32 %s520_s8, 4  ;;  %s525_s6 = sshll.u32 %s523_s14, 4  ;;  %s528_s7 = int_to_ptr.vmem [resolvable:$true] %s527_s7  ;;  %s526_s6 = int_to_ptr.hbm [resolvable:$true] %s525_s6 }
  0x33   : > { %s2808_s18 = scalar_select %p106_p12, %s2573_s20, %s108_s10  }
  0x34   : > { %p2819_p0 = pnand %p2179_p11, %p2788_p9  ;;  %s2825_s9 = scalar_lea.sflag [#allocation7], %s3310_s30 }
  0x35   : > { %3350 = sst [smem:[#allocation26_spill]] %s2808_s18  ;;  %s2052_s8 = sadd.s32 4294967294, %s2605_s28  }
  0x36   : > { %2167 = dma.hbm_to_vmem [thread:$0]  (!%p2819_p0), %s526_s6, 16, %s528_s7, %s2825_s9  }
  0x37   : > { %s49_s13 = sadd.s32 1, %s2601_s27  ;;  %s56_s25 = sadd.s32 1, %s2585_s23 }
  0x38   : > { %s3404_s13 = smov (!%p2774_p6, %s49_s13), %s2601_s27  ;;  %p63_p2 = scmp.ne.s32.totalorder %s2585_s23, %s2581_s22 }
  0x39   : > { %p51_p4 = scmp.ge.s32.totalorder %s3404_s13, 2  ;;  %p69_p5 = scmp.ne.s32.totalorder %s2581_s22, %s2577_s21 }
  0x3a   : > { %p2842_p8 = por %p64_p7, %p63_p2  ;;  %p447_p9 = scmp.eq.s32.totalorder %s2757_s29, 3 }
  0x3b   : > { %s3406_s13 = smov (%p51_p4, %s3404_s13), 0  ;;  %p2851_p10 = por %p70_p1, %p69_p5 }
  0x3c   : > { %3354 = sst [smem:[#allocation27_spill]] %s3406_s13  ;;  %p2855_p6 = por %p447_p9, %p63_p2 }
  0x3d   : > { %s53_s12 = ssub.s32 %s2601_s27, %s3406_s13  ;;  %p453_p7 = scmp.eq.s32.totalorder %s2052_s8, 3 }
  0x3e   : > { %s3356_s7 = scalar_select %p2855_p6, 1, 0 }
  0x3f   : > { %p54_p12 = scmp.eq.s32.totalorder %s53_s12, 0  ;;  %s490_s30 = sand.u32 1, %s2585_s23  }
  0x40   : > { %3357 = sst [smem:[#allocation28_spill]] %s3356_s7  ;;  %p2862_p4 = por %p453_p7, %p69_p5 }
  0x41   : > { %s2867_s18 = scalar_select %p54_p12, %s2585_s23, %s56_s25  }
  0x42   : > { %s2056_s20 = sshll.u32 %s490_s30, 3  ;;  %s2057_s21 = sshll.u32 %s2601_s27, 3 }
  0x43   : > { %3359 = sst [smem:[#allocation29_spill]] %s2867_s18  ;;  %s494_s4 = scalar_lea.vmem [#allocation3], %s2056_s20 }
  0x44   : > { %s3360_s0 = sld [smem:[#allocation30_spill]]  ;;  %s502_s8 = sshll.u32 %s494_s4, 4  ;;  %s503_s8 = int_to_ptr.vmem [resolvable:$true] %s502_s8 }
  0x45   : > { %p2162_p2 = pnand %p2179_p11, %p2842_p8  ;;  %s3361_s5 = sld [smem:[#allocation35_spill]] }
  0x46   : > { %s551_s1 = scalar_lea.vmem [#allocation8], %s2805_s16  ;;  %s3362_s11 = sld [smem:[#allocation41_spill]] }
  0x47   : > { %s558_s3 = sshll.u32 %s551_s1, 4  ;;  %s3363_s25 = sand.u32 1, %s2605_s28   ;;  %s559_s3 = int_to_ptr.vmem [resolvable:$true] %s558_s3 }
  0x48   : > { %s600_s12 = scalar_lea.sflag [#allocation10], %s3363_s25 }
  0x4a   : > { %s498_s7 = scalar_lea.hbm %s3360_s0, %s2057_s21  ;;  %s491_s21 = scalar_lea.sflag [#allocation4], %s490_s30 }
  0x4b   : > { %s500_s13 = sshll.u32 %s498_s7, 4  ;;  %s554_s27 = scalar_lea.hbm %s3361_s5, %s2597_s26  ;;  %s501_s13 = int_to_ptr.hbm [resolvable:$true] %s500_s13 }
  0x4c   : > { %s556_s18 = sshll.u32 %s554_s27, 4  ;;  %s605_s14 = scalar_lea.hbm %s3362_s11, %s2597_s26  ;;  %s557_s18 = int_to_ptr.hbm [resolvable:$true] %s556_s18 }
  0x4d   : > { %2164 = dma.hbm_to_vmem [thread:$0]  (!%p2162_p2), %s501_s13, 128, %s503_s8, %s491_s21  }
  0x4e   : > { %2170 = dma.hbm_to_vmem [thread:$0]  (!%p2819_p0), %s557_s18, 16, %s559_s3, %s2825_s9  }
  0x4f   : > { %s607_s7 = sshll.u32 %s605_s14, 4  ;;  %s602_s0 = scalar_lea.vmem [#allocation9], %s2805_s16  ;;  %s608_s7 = int_to_ptr.hbm [resolvable:$true] %s607_s7 }
  0x50   : > { %s609_s23 = sshll.u32 %s602_s0, 4  ;;  %624 = sbr.rel (%p2765_p3) target bundleno = 2560 (0xa00), region = 80  ;;  %s610_s23 = int_to_ptr.vmem [resolvable:$true] %s609_s23 }
  0x51   : > { %2173 = dma.hbm_to_vmem [thread:$0]  (!%p2819_p0), %s608_s7, 16, %s610_s23, %s600_s12  }
  0x52   : > { %s2897_s27 = sand.u32 (!%p2765_p3), 1, %s2581_s22  }
  0x53   : > { %s3318_s30 = sshll.u32 (!%p2765_p3), %s2897_s27, 3  ;;  %s627_s18 = scalar_lea.sflag (!%p2765_p3), [#allocation4], %s2897_s27 }
  0x54   : > { %s2903_s0 = scalar_lea.vmem (!%p2765_p3), [#allocation3], %s3318_s30 }
  0x55   : > { %2544 = dma.done.wait (%p2851_p10), %s627_s18, 128  }
  0x56   : > { %2546 = vsyncadd (%p2851_p10), %s627_s18, 4294967168  ;;  %s636_s15 = sand.u32 1, %s2757_s29   ;;  %s2911_s23 = sand.u32 1, %s2569_s19  }
  0x57   : > { %s637_s16 = scalar_lea.sflag [#allocation7], %s636_s15 }
  0x58   : > { %2548 = dma.done.wait (%p2799_p13), %s637_s16, 32  }
  0x59   : > { %2550 = vsyncadd (%p2799_p13), %s637_s16, 4294967264  ;;  %s655_s13 = scalar_lea.sflag [#allocation10], %s636_s15 }
  0x5a   : > { %2552 = dma.done.wait (%p2799_p13), %s655_s13, 16  }
  0x5b   : > { %2554 = vsyncadd (%p2799_p13), %s655_s13, 4294967280 }
  0x5c   : > { %2556 = dma.done.wait (%p70_p1), [#allocation10], 512  }
  0x5d   : > { %2558 = vsyncadd (%p70_p1), [#allocation10], 4294966784  ;;  %p757_p3 = scmp.lt.s32.totalorder %s2589_s24, 1  ;;  %s3365_s14 = sld [smem:[#allocation31_spill]] }
  0x5e   : > { %s3366_s18 = sld [smem:[#allocation33_spill]]  ;;  %p2070_p1 = scmp.ne.s32.totalorder %s2589_s24, 0 }
  0x5f   : > { %s2930_s8 = scalar_select %p757_p3, %s2589_s24, 1 }
  0x60   : > { %s3368_s5 = sld [smem:[#allocation37_spill]] }
  0x61   : > { %s2129_s17 = sshll.u32 %s2930_s8, 4  ;;  %s3369_s21 = sld [smem:[#allocation38_spill]] }
  0x62   : > { %s2132_s29 = sshll.u32 %s2930_s8, 5  ;;  %s3370_s26 = sld [smem:[#allocation39_spill]] }
  0x63   : > { %s761_s7 = scalar_lea.vmem %s3365_s14, %s2129_s17  ;;  %s3371_s22 = sld [smem:[#allocation40_spill]] }
  0x64   : > { %s2943_s15 = scalar_lea.vmem %s3366_s18, %s2129_s17  ;;  %s3372_s9 = sld [smem:[#allocation42_spill]] }
  0x66   : > { %s2952_s11 = scalar_lea.vmem %s3368_s5, %s2129_s17  ;;  %s3373_s5 = sshll.u32 %s2897_s27, 3 }
  0x67   : > { %s780_s4 = scalar_lea.vmem %s3369_s21, %s2930_s8  ;;  %s2974_s10 = scalar_lea.vmem [#allocation12], %s3373_s5 }
  0x68   : > { %s2962_s25 = scalar_lea.vmem %s3370_s26, %s2132_s29  ;;  %796 = sbr.rel (%p2070_p1) target bundleno = 111 (0x6f), region = 104 }
  0x69   : > { %s788_s16 = scalar_lea.vmem %s3371_s22, %s2930_s8 }
  0x6a   : > { %s791_s30 = scalar_lea.vmem %s3372_s9, %s2930_s8 }
  0x6d   : > { %v797_v0 = vld [vmem:[%s2903_s0] sm:$0xff]  ;;  %vm798_vm0 = vcmask 261120  }
  0x6e   : > { %799 = vst.msk [vmem:[#allocation2] sm:$0xff] %vm798_vm0, %v797_v0 }
  0x6f PF: > { %v2134_v1 = vld [vmem:[%s761_s7 + $0x8] sm:$0xff]  ;;  %v2133_v2 = vld [vmem:[%s761_s7] sm:$0xff]  ;;  %vm822_vm1 = vcmask 261120   ;;  %s3374_s22 = scalar_lea.vmem [#allocation6], %s2911_s23  ;;  %s2610_s26 = smov 104   ;;  %vm870_vm2 = vcmask 1047556  }
  0x70   : > { %832 = vmatpush.bf16.msra.mxu0 %v2134_v1  ;;  %v2284_v5 = vld [vmem:[%s3374_s22] ss:$0 sm:$0xff]  ;;  %s2611_s0 = smov 120   ;;  %s2612_s9 = smov 96   ;;  %v2615_v14 = vmov 1983009808  }
  0x71   : > { %s2613_s17 = smov 112   ;;  %s2614_s7 = smov 64   ;;  %v861_v15 = vunpack.c.l.s4 %v2615_v14  ;;  %v2616_v26 = vmov 1934713408   ;;  %vm1206_vm3 = vcmask 64512   ;;  %vm1338_vm4 = vcmask 1043456  }
  0x72   : > { %v875_v27 = vunpack.c.l.s4 %v2616_v26  ;;  %s2617_s1 = smov 24   ;;  %s2618_s3 = smov 16   ;;  %vm1536_vm5 = vcmask 130048   ;;  %vm1538_vm6 = vcmask 195584   ;;  %vm1700_vm11 = vcmask 523264  }
  0x73   : > { %v2998_v20 = vunpack.c.0.s8 %v861_v15  ;;  %s2619_s21 = smov 8   ;;  %s3375_s14 = sld [smem:[#allocation34_spill]] }
  0x74   : > { %833 = vmatpush.bf16.msra.mxu0 %v2133_v2  ;;  %v3007_v32 = vunpack.c.0.s8 %v875_v27  ;;  %s3378_s6 = sld [smem:[#allocation36_spill]]  ;;  %p2123_p11 = scmp.ne.s32.totalorder %s2589_s24, 1 }
  0x75   : > { %v2978_v3 = vld [vmem:[#allocation2] sm:$0xff] }
  0x76   : > { %v801_v4 = vpack.c.bf16 %v2978_v3, %v2978_v3 }
  0x78   : > { %2079 = vmatmul.msk.bf16.vlgmr.msra.gmra.mxu0 %vm822_vm1, %v801_v4 }
  0x79   : > { %s3376_s12 = scalar_lea.vmem %s3375_s14, %s2930_s8 }
  0x7a   : > { %s3379_s13 = scalar_lea.vmem %s3378_s6, %s2930_s8 }
  0xf5   : > { %v835_v6 = vpop.f32.mrf.mxu0 }
  0xf6   : > { %v836_v7 = vadd.f32 %v2284_v5, %v835_v6 }
  0xf8   : > { %v839_v8 = vpack.c.bf16 %v836_v7, %v836_v7 }
  0xfa   : > { %845 = vrot.lane.b32.xlu1 %v839_v8, %s2610_s26  ;;  %841 = vrot.lane.b32.xlu0 %v839_v8, %s2611_s0  ;;  %v850_v16 = vshrl.u32 %v839_v8, 16 }
  0xfd   : > { %v837_v9 = vpop.f32.mrf.mxu0 }
 0x102   : > { %962 = vrot.lane.b32.xlu1 %v839_v8, %s2612_s9  ;;  %843 = vrot.lane.b32.xlu0 %v839_v8, %s2613_s17 }
 0x10a   : > { %1084 = vrot.lane.b32.xlu1 %v839_v8, %s2614_s7 }
 0x16c   : > { %v2986_v10 = vpop.permute.xlu1 %845  ;;  %v2988_v11 = vpop.permute.xlu0 %841 }
 0x16d   : > { %968 = vrot.lane.b32.xlu0 %v2986_v10, %s2612_s9  ;;  %964 = vrot.lane.b32.xlu2 %v2988_v11, %s2612_s9  ;;  %v851_v13 = vshrl.u32 %v2988_v11, 16  ;;  %v857_v18 = vshrl.u32 %v2986_v10, 16  ;;  %v849_v21 = vpack.i.b16 %v2988_v11, %v839_v8 }
 0x16f   : > { %v852_v19 = vpack.i.b16 %v851_v13, %v850_v16  ;;  %v863_v25 = vperm.slane %v849_v21, %v2998_v20 }
 0x171   : > { %v890_v24 = vperm.slane %v852_v19, %v2998_v20  ;;  %v872_v31 = vrot.slane %v863_v25, 4 }
 0x173   : > { %v898_v30 = vrot.slane %v890_v24, 4 }
 0x174   : > { %v2992_v12 = vpop.permute.xlu0 %843  ;;  %v963_v39 = vpop.permute.xlu1 %962 }
 0x175   : > { %966 = vrot.lane.b32.xlu2 %v2992_v12, %s2612_s9  ;;  %v856_v17 = vshrl.u32 %v2992_v12, 16  ;;  %v855_v23 = vpack.i.b16 %v2986_v10, %v2992_v12  ;;  %v973_v44 = vshrl.u32 %v963_v39, 16 }
 0x177   : > { %v858_v22 = vpack.i.b16 %v857_v18, %v856_v17  ;;  %v868_v29 = vperm.slane %v855_v23, %v2998_v20 }
 0x179   : > { %v895_v28 = vperm.slane %v858_v22, %v2998_v20  ;;  %v869_v36 = vrot.slane %v868_v29, 4  ;;  %v873_v37 = vsel %vm870_vm2, %v868_v29, %v872_v31 }
 0x17a   : > { %v881_v40 = vperm.slane %v873_v37, %v3007_v32 }
 0x17b   : > { %v896_v33 = vrot.slane %v895_v28, 4  ;;  %v899_v34 = vsel %vm870_vm2, %v895_v28, %v898_v30  ;;  %v871_v42 = vsel %vm870_vm2, %v869_v36, %v863_v25 }
 0x17c   : > { %v907_v38 = vperm.slane %v899_v34, %v3007_v32  ;;  %v877_v48 = vperm.slane %v871_v42, %v3007_v32  ;;  %v884_v49 = vrot.slane %v881_v40, 4 }
 0x17d   : > { %v897_v41 = vsel %vm870_vm2, %v896_v33, %v890_v24 }
 0x17e   : > { %v903_v45 = vperm.slane %v897_v41, %v3007_v32  ;;  %v910_v46 = vrot.slane %v907_v38, 4  ;;  %v882_v55 = vrot.slane %v877_v48, 4  ;;  %v885_v56 = vsel %vm870_vm2, 0, %v884_v49 }
 0x17f   : > { %v917_v4 = vrot.slane %v885_v56, 4  ;;  %v912_v41 = vsel %vm870_vm2, %v884_v49, %v877_v48 }
 0x180   : > { %v908_v52 = vrot.slane %v903_v45, 4  ;;  %v911_v53 = vsel %vm870_vm2, 0, %v910_v46  ;;  %v883_v5 = vsel %vm870_vm2, 0, %v882_v55  ;;  %v931_v38 = vsel %vm870_vm2, %v910_v46, %v903_v45 }
 0x181   : > { %v936_v62 = vrot.slane %v911_v53, 4  ;;  %v918_v22 = vsel %vm870_vm2, %v917_v4, %v883_v5  ;;  %v935_v53 = vperm.slane %v931_v38, %v2998_v20  ;;  %v916_v45 = vperm.slane %v912_v41, %v2998_v20 }
 0x182   : > { %v909_v2 = vsel %vm870_vm2, 0, %v908_v52  ;;  %v922_v30 = vperm.slane %v918_v22, %v2998_v20 }
 0x183   : > { %v937_v14 = vsel %vm870_vm2, %v936_v62, %v909_v2 }
 0x184   : > { %v941_v24 = vperm.slane %v937_v14, %v2998_v20 }
 0x186   : > { %v942_v42 = vrot.slane %v941_v24, 4 }
 0x188   : > { %v943_v49 = vsel %vm870_vm2, %v942_v42, %v935_v53 }
 0x1c7   : > { %v965_v35 = vpop.permute.xlu2 %964 }
 0x1c8   : > { %v974_v43 = vshrl.u32 %v965_v35, 16  ;;  %v972_v47 = vpack.i.b16 %v965_v35, %v963_v39 }
 0x1ca   : > { %v975_v50 = vpack.i.b16 %v974_v43, %v973_v44  ;;  %v986_v54 = vperm.slane %v972_v47, %v2998_v20  ;;  %v923_v47 = vrot.slane %v922_v30, 4 }
 0x1cc   : > { %v1012_v58 = vperm.slane %v975_v50, %v2998_v20  ;;  %v994_v63 = vrot.slane %v986_v54, 4  ;;  %v924_v56 = vsel %vm870_vm2, %v923_v47, %v916_v45 }
 0x1cd   : > { %v928_v62 = vperm.slane %v924_v56, %v3007_v32 }
 0x1ce   : > { %v1020_v6 = vrot.slane %v1012_v58, 4 }
 0x1cf   : > { %v967_v51 = vpop.permute.xlu2 %966 }
 0x1d0   : > { %v979_v59 = vshrl.u32 %v967_v51, 16 }
 0x1df   : > { %v969_v57 = vpop.permute.xlu0 %968 }
 0x1e0   : > { %v978_v60 = vpack.i.b16 %v969_v57, %v967_v51  ;;  %v980_v61 = vshrl.u32 %v969_v57, 16 }
 0x1e2   : > { %v981_v0 = vpack.i.b16 %v980_v61, %v979_v59  ;;  %v991_v1 = vperm.slane %v978_v60, %v2998_v20  ;;  %v947_v60 = vperm.slane %v943_v49, %v3007_v32 }
 0x1e4   : > { %v992_v7 = vrot.slane %v991_v1, 4  ;;  %v995_v8 = vsel %vm870_vm2, %v991_v1, %v994_v63  ;;  %v1017_v9 = vperm.slane %v981_v0, %v2998_v20  ;;  %v952_v22 = vpack.i.b16 %v947_v60, %v928_v62 }
 0x1e5   : > { %v1003_v13 = vperm.slane %v995_v8, %v3007_v32 }
 0x1e6   : > { %v993_v15 = vsel %vm870_vm2, %v992_v7, %v986_v54  ;;  %v1018_v16 = vrot.slane %v1017_v9, 4  ;;  %v1021_v17 = vsel %vm870_vm2, %v1017_v9, %v1020_v6  ;;  %v948_v7 = vrot.slane %v947_v60, 4 }
 0x1e7   : > { %v999_v18 = vperm.slane %v993_v15, %v3007_v32  ;;  %v1006_v19 = vrot.slane %v1003_v13, 4  ;;  %v1029_v21 = vperm.slane %v1021_v17, %v3007_v32  ;;  %v929_v15 = vrot.slane %v928_v62, 4 }
 0x1e8   : > { %v1019_v23 = vsel %vm870_vm2, %v1018_v16, %v1012_v58 }
 0x1e9   : > { %v1004_v25 = vrot.slane %v999_v18, 4  ;;  %v1007_v26 = vsel %vm870_vm2, 0, %v1006_v19  ;;  %v1025_v27 = vperm.slane %v1019_v23, %v3007_v32  ;;  %v1032_v28 = vrot.slane %v1029_v21, 4 }
 0x1ea   : > { %v1039_v29 = vrot.slane %v1007_v26, 4  ;;  %v1034_v36 = vsel %vm870_vm2, %v1006_v19, %v999_v18  ;;  %v954_v18 = vshrl.u32 %v947_v60, 16  ;;  %v949_v19 = vsel %vm870_vm2, 0, %v948_v7 }
 0x1eb   : > { %v1005_v31 = vsel %vm870_vm2, 0, %v1004_v25  ;;  %v1030_v33 = vrot.slane %v1025_v27, 4  ;;  %v1033_v34 = vsel %vm870_vm2, 0, %v1032_v28  ;;  %v1053_v43 = vsel %vm870_vm2, %v1032_v28, %v1025_v27 }
 0x1ec   : > { %v1058_v35 = vrot.slane %v1033_v34, 4  ;;  %v1040_v37 = vsel %vm870_vm2, %v1039_v29, %v1005_v31  ;;  %v1038_v50 = vperm.slane %v1034_v36, %v2998_v20  ;;  %v1057_v54 = vperm.slane %v1053_v43, %v2998_v20 }
 0x1ed   : > { %v1031_v39 = vsel %vm870_vm2, 0, %v1030_v33  ;;  %v1044_v40 = vperm.slane %v1040_v37, %v2998_v20  ;;  %v953_v23 = vshrl.u32 %v928_v62, 16  ;;  %v930_v24 = vsel %vm870_vm2, 0, %v929_v15 }
 0x1ee   : > { %v1059_v44 = vsel %vm870_vm2, %v1058_v35, %v1031_v39  ;;  %v960_v25 = vshrl.u32 %v949_v19, 16  ;;  %v958_v27 = vpack.i.b16 %v949_v19, %v930_v24  ;;  %v959_v28 = vshrl.u32 %v930_v24, 16 }
 0x1ef   : > { %v1045_v51 = vrot.slane %v1044_v40, 4  ;;  %v1063_v52 = vperm.slane %v1059_v44, %v2998_v20  ;;  %v955_v26 = vpack.i.b16 %v954_v18, %v953_v23 }
 0x1f0   : > { %v961_v29 = vpack.i.b16 %v960_v25, %v959_v28 }
 0x1f1   : > { %v1046_v46 = vsel %vm870_vm2, %v1045_v51, %v1038_v50  ;;  %v1064_v48 = vrot.slane %v1063_v52, 4  ;;  %v1085_v52 = vpop.permute.xlu1 %1084 }
 0x1f2   : > { %v1050_v55 = vperm.slane %v1046_v46, %v3007_v32 }
 0x1f3   : > { %v1065_v57 = vsel %vm870_vm2, %v1064_v48, %v1057_v54 }
 0x1f4   : > { %v1069_v58 = vperm.slane %v1065_v57, %v3007_v32  ;;  %v1051_v59 = vrot.slane %v1050_v55, 4  ;;  %v1075_v61 = vshrl.u32 %v1050_v55, 16 }
 0x1f6   : > { %v1074_v63 = vpack.i.b16 %v1069_v58, %v1050_v55  ;;  %v1076_v0 = vshrl.u32 %v1069_v58, 16  ;;  %v1052_v1 = vsel %vm870_vm2, 0, %v1051_v59  ;;  %v1070_v2 = vrot.slane %v1069_v58, 4 }
 0x1f7   : > { %v1081_v9 = vshrl.u32 %v1052_v1, 16 }
 0x1f8   : > { %v1211_v4 = vsel %vm1206_vm3, %v1074_v63, 0  ;;  %v1077_v5 = vpack.i.b16 %v1076_v0, %v1075_v61  ;;  %v1071_v6 = vsel %vm870_vm2, 0, %v1070_v2  ;;  %v1095_v2 = vshrl.u32 %v1085_v52, 16 }
 0x1f9   : > { %1220 = vmatpush.bf16.xpose.msra.mxu1 %v1211_v4  ;;  %v1080_v8 = vpack.i.b16 %v1071_v6, %v1052_v1  ;;  %v1082_v13 = vshrl.u32 %v1071_v6, 16 }
 0x1fa   : > { %v1230_v14 = vsel %vm1206_vm3, %v1077_v5, 0 }
 0x1fb   : > { %1239 = vmatpush.bf16.xpose.msra.mxu2 %v1230_v14  ;;  %v1249_v16 = vsel %vm1206_vm3, %v1080_v8, 0  ;;  %v1083_v17 = vpack.i.b16 %v1082_v13, %v1081_v9 }
 0x1fc   : > { %1258 = vmatpush.bf16.xpose.msra.mxu3 %v1249_v16 }
 0x1fd   : > { %v1268_v21 = vsel %vm1206_vm3, %v1083_v17, 0 }
 0x1fe   : > { %1277 = vmatpush.bf16.xpose.msrb.mxu0 %v1268_v21 }
 0x200   : > { %2080 = vmatmul.msk.bf16.vlgmr.msra.gmra.mxu1 %vm1206_vm3, %v952_v22 }
 0x202   : > { %2081 = vmatmul.msk.bf16.vlgmr.msra.gmra.mxu2 %vm1206_vm3, %v955_v26 }
 0x203   : > { %2082 = vmatmul.msk.bf16.vlgmr.msra.gmra.mxu3 %vm1206_vm3, %v958_v27 }
 0x205   : > { %2083 = vmatmul.msk.bf16.vlgmr.msrb.gmra.mxu0 %vm1206_vm3, %v961_v29 }
 0x27d   : > { %v1222_v30 = vpop.f32.mrf.mxu1 }
 0x27e   : > { %v1283_v31 = vmul.f32 0.35355338, %v1222_v30 }
 0x280   : > { %v1287_v33 = vsel %vm1206_vm3, %v1283_v31, -inf }
 0x281   : > { %1288 = vmax.xlane.f32.xlu0 %v1287_v33 }
 0x282   : > { %v1279_v34 = vpop.f32.mrf.mxu0 }
 0x283   : > { %v1286_v35 = vmul.f32 0.35355338, %v1279_v34 }
 0x285   : > { %v1224_v36 = vpop.f32.mrf.mxu1  ;;  %v1241_v37 = vpop.f32.mrf.mxu2  ;;  %v1296_v38 = vsel %vm1206_vm3, %v1286_v35, -inf }
 0x286   : > { %1297 = vmax.xlane.f32.xlu2 %v1296_v38  ;;  %v1260_v39 = vpop.f32.mrf.mxu3  ;;  %v1284_v41 = vmul.f32 0.35355338, %v1241_v37 }
 0x287   : > { %v1285_v40 = vmul.f32 0.35355338, %v1260_v39 }
 0x288   : > { %v1290_v47 = vsel %vm1206_vm3, %v1284_v41, -inf }
 0x289   : > { %v1293_v42 = vsel %vm1206_vm3, %v1285_v40, -inf }
 0x28a   : > { %v1281_v43 = vpop.f32.mrf.mxu0  ;;  %1294 = vmax.xlane.f32.xlu1 %v1293_v42 }
 0x28d   : > { %v1243_v44 = vpop.f32.mrf.mxu2 }
 0x28e   : > { %1291 = vmax.xlane.f32.xlu2 %v1290_v47  ;;  %v1262_v50 = vpop.f32.mrf.mxu3 }
 0x295   : > { %1088 = vrot.lane.b32.xlu0 %v2992_v12, %s2614_s7 }
 0x2a3   : > { %1090 = vrot.lane.b32.xlu1 %v2986_v10, %s2614_s7 }
 0x2a6   : > { %1086 = vrot.lane.b32.xlu2 %v2988_v11, %s2614_s7 }
 0x2f4   : > { %v1289_v51 = vpop.xlane.xlu0 %1288 }
 0x2f5   : > { %v1299_v53 = vsub.f32 %v1283_v31, %v1289_v51 }
 0x2f7   : > { %v1303_v45 = vmul.f32 1.442695, %v1299_v53 }
 0x2f9   : > { %2292 = vpow2.f32 %v1303_v45  ;;  %v1298_v46 = vpop.xlane.xlu2 %1297 }
 0x2fa   : > { %v1302_v55 = vsub.f32 %v1286_v35, %v1298_v46 }
 0x2fc   : > { %v1309_v11 = vmul.f32 1.442695, %v1302_v55 }
 0x2fd   : > { %v1295_v54 = vpop.xlane.xlu1 %1294 }
 0x2fe   : > { %v1301_v48 = vsub.f32 %v1285_v40, %v1295_v54 }
 0x2ff   : > { %v3083_v49 = vpop.eup %2292 }
 0x300   : > { %v1307_v56 = vmul.f32 1.442695, %v1301_v48  ;;  %v1311_v12 = vsel %vm1206_vm3, %v3083_v49, 0.0 }
 0x301   : > { %v1292_v57 = vpop.xlane.xlu2 %1291  ;;  %1312 = vadd.xlane.f32.xlu1 %v1311_v12 }
 0x302   : > { %2294 = vpow2.f32 %v1307_v56  ;;  %v1300_v10 = vsub.f32 %v1284_v41, %v1292_v57 }
 0x304   : > { %v1305_v58 = vmul.f32 1.442695, %v1300_v10 }
 0x306   : > { %2296 = vpow2.f32 %v1305_v58 }
 0x307   : > { %2298 = vpow2.f32 %v1309_v11  ;;  %v1089_v7 = vpop.permute.xlu0 %1088 }
 0x308   : > { %v3087_v59 = vpop.eup %2294  ;;  %v1101_v13 = vshrl.u32 %v1089_v7, 16 }
 0x309   : > { %v1317_v60 = vsel %vm1206_vm3, %v3087_v59, 0.0  ;;  %v1087_v61 = vpop.permute.xlu2 %1086 }
 0x30a   : > { %1318 = vadd.xlane.f32.xlu0 %v1317_v60  ;;  %v1096_v1 = vshrl.u32 %v1087_v61, 16  ;;  %v1094_v4 = vpack.i.b16 %v1087_v61, %v1085_v52 }
 0x30c   : > { %v3091_v62 = vpop.eup %2296  ;;  %v1097_v6 = vpack.i.b16 %v1096_v1, %v1095_v2  ;;  %v1108_v8 = vperm.slane %v1094_v4, %v2998_v20 }
 0x30d   : > { %v1314_v63 = vsel %vm1206_vm3, %v3091_v62, 0.0  ;;  %v3095_v0 = vpop.eup %2298 }
 0x30e   : > { %1315 = vadd.xlane.f32.xlu2 %v1314_v63  ;;  %v1320_v5 = vsel %vm1206_vm3, %v3095_v0, 0.0  ;;  %v1134_v14 = vperm.slane %v1097_v6, %v2998_v20  ;;  %v1116_v17 = vrot.slane %v1108_v8, 4 }
 0x310   : > { %v1142_v21 = vrot.slane %v1134_v14, 4 }
 0x312   : > { %1321 = vadd.xlane.f32.xlu0 %v1320_v5 }
 0x315   : > { %v1091_v9 = vpop.permute.xlu1 %1090 }
 0x316   : > { %v1100_v15 = vpack.i.b16 %v1091_v9, %v1089_v7  ;;  %v1102_v16 = vshrl.u32 %v1091_v9, 16 }
 0x318   : > { %v1103_v18 = vpack.i.b16 %v1102_v16, %v1101_v13  ;;  %v1113_v19 = vperm.slane %v1100_v15, %v2998_v20 }
 0x31a   : > { %v1114_v22 = vrot.slane %v1113_v19, 4  ;;  %v1117_v23 = vsel %vm870_vm2, %v1113_v19, %v1116_v17  ;;  %v1139_v24 = vperm.slane %v1103_v18, %v2998_v20 }
 0x31b   : > { %v1125_v25 = vperm.slane %v1117_v23, %v3007_v32 }
 0x31c   : > { %v1115_v26 = vsel %vm870_vm2, %v1114_v22, %v1108_v8  ;;  %v1140_v27 = vrot.slane %v1139_v24, 4  ;;  %v1143_v28 = vsel %vm870_vm2, %v1139_v24, %v1142_v21 }
 0x31d   : > { %v1121_v29 = vperm.slane %v1115_v26, %v3007_v32  ;;  %v1128_v30 = vrot.slane %v1125_v25, 4  ;;  %v1151_v31 = vperm.slane %v1143_v28, %v3007_v32 }
 0x31e   : > { %v1141_v33 = vsel %vm870_vm2, %v1140_v27, %v1134_v14 }
 0x31f   : > { %v1126_v34 = vrot.slane %v1121_v29, 4  ;;  %v1129_v35 = vsel %vm870_vm2, 0, %v1128_v30  ;;  %v1147_v36 = vperm.slane %v1141_v33, %v3007_v32  ;;  %v1154_v37 = vrot.slane %v1151_v31, 4 }
 0x320   : > { %v1161_v38 = vrot.slane %v1129_v35, 4  ;;  %v1156_v43 = vsel %vm870_vm2, %v1128_v30, %v1121_v29 }
 0x321   : > { %v1127_v39 = vsel %vm870_vm2, 0, %v1126_v34  ;;  %v1152_v40 = vrot.slane %v1147_v36, 4  ;;  %v1155_v41 = vsel %vm870_vm2, 0, %v1154_v37  ;;  %v1175_v51 = vsel %vm870_vm2, %v1154_v37, %v1147_v36 }
 0x322   : > { %v1180_v42 = vrot.slane %v1155_v41, 4  ;;  %v1162_v44 = vsel %vm870_vm2, %v1161_v38, %v1127_v39  ;;  %v1160_v53 = vperm.slane %v1156_v43, %v2998_v20  ;;  %v1179_v48 = vperm.slane %v1175_v51, %v2998_v20 }
 0x323   : > { %v1153_v47 = vsel %vm870_vm2, 0, %v1152_v40  ;;  %v1166_v50 = vperm.slane %v1162_v44, %v2998_v20 }
 0x324   : > { %v1181_v52 = vsel %vm870_vm2, %v1180_v42, %v1153_v47 }
 0x325   : > { %v1167_v45 = vrot.slane %v1166_v50, 4  ;;  %v1185_v46 = vperm.slane %v1181_v52, %v2998_v20 }
 0x327   : > { %v1168_v54 = vsel %vm870_vm2, %v1167_v45, %v1160_v53  ;;  %v1186_v55 = vrot.slane %v1185_v46, 4 }
 0x328   : > { %v1172_v56 = vperm.slane %v1168_v54, %v3007_v32 }
 0x329   : > { %v1187_v12 = vsel %vm870_vm2, %v1186_v55, %v1179_v48 }
 0x32a   : > { %v1191_v57 = vperm.slane %v1187_v12, %v3007_v32  ;;  %v1173_v10 = vrot.slane %v1172_v56, 4  ;;  %v1197_v11 = vshrl.u32 %v1172_v56, 16 }
 0x32c   : > { %v1196_v58 = vpack.i.b16 %v1191_v57, %v1172_v56  ;;  %v1198_v60 = vshrl.u32 %v1191_v57, 16  ;;  %v1174_v61 = vsel %vm870_vm2, 0, %v1173_v10  ;;  %v1192_v63 = vrot.slane %v1191_v57, 4 }
 0x32d   : > { %v1203_v6 = vshrl.u32 %v1174_v61, 16 }
 0x32e   : > { %v1340_v1 = vsel %vm1338_vm4, %v1196_v58, 0  ;;  %v1199_v2 = vpack.i.b16 %v1198_v60, %v1197_v11  ;;  %v1193_v4 = vsel %vm870_vm2, 0, %v1192_v63 }
 0x32f   : > { %1349 = vmatpush.bf16.msrb.mxu1 %v1340_v1  ;;  %v1202_v5 = vpack.i.b16 %v1193_v4, %v1174_v61  ;;  %v1204_v7 = vshrl.u32 %v1193_v4, 16 }
 0x330   : > { %v1359_v8 = vsel %vm1338_vm4, %v1199_v2, 0 }
 0x331   : > { %1368 = vmatpush.bf16.msrb.mxu2 %v1359_v8  ;;  %v1378_v9 = vsel %vm1338_vm4, %v1202_v5, 0  ;;  %v1205_v13 = vpack.i.b16 %v1204_v7, %v1203_v6 }
 0x332   : > { %1387 = vmatpush.bf16.msrb.mxu3 %v1378_v9 }
 0x333   : > { %v1397_v14 = vsel %vm1338_vm4, %v1205_v13, 0 }
 0x334   : > { %1406 = vmatpush.bf16.msra.mxu0 %v1397_v14 }
 0x374   : > { %v1313_v15 = vpop.xlane.xlu1 %1312 }
 0x375   : > { %2300 = vrcp.f32 %v1313_v15 }
 0x37b   : > { %v2301_v16 = vpop.eup %2300 }
 0x37c   : > { %v1327_v17 = vmul.f32 %v2301_v16, %v3083_v49 }
 0x37d   : > { %v1319_v18 = vpop.xlane.xlu0 %1318 }
 0x37e   : > { %2302 = vrcp.f32 %v1319_v18  ;;  %v1331_v19 = vpack.c.bf16 %v1327_v17, %v1327_v17 }
 0x380   : > { %2084 = vmatmul.msk.bf16.vlgmr.msrb.gmra.mxu1 %vm1206_vm3, %v1331_v19 }
 0x381   : > { %v1316_v21 = vpop.xlane.xlu2 %1315 }
 0x382   : > { %2304 = vrcp.f32 %v1316_v21 }
 0x384   : > { %v2303_v22 = vpop.eup %2302 }
 0x385   : > { %v1329_v23 = vmul.f32 %v2303_v22, %v3087_v59  ;;  %v1322_v24 = vpop.xlane.xlu0 %1321 }
 0x386   : > { %2306 = vrcp.f32 %v1322_v24 }
 0x387   : > { %v1333_v25 = vpack.c.bf16 %v1329_v23, %v1329_v23 }
 0x388   : > { %v2305_v26 = vpop.eup %2304 }
 0x389   : > { %v1328_v27 = vmul.f32 %v2305_v26, %v3091_v62  ;;  %2086 = vmatmul.msk.bf16.vlgmr.msrb.gmra.mxu3 %vm1206_vm3, %v1333_v25 }
 0x38b   : > { %v1332_v28 = vpack.c.bf16 %v1328_v27, %v1328_v27 }
 0x38c   : > { %v2307_v49 = vpop.eup %2306 }
 0x38d   : > { %v1330_v29 = vmul.f32 %v2307_v49, %v3095_v0  ;;  %2085 = vmatmul.msk.bf16.vlgmr.msrb.gmra.mxu2 %vm1206_vm3, %v1332_v28 }
 0x38f   : > { %v1334_v30 = vpack.c.bf16 %v1330_v29, %v1330_v29 }
 0x391   : > { %2087 = vmatmul.msk.bf16.vlgmr.msra.gmra.mxu0 %vm1206_vm3, %v1334_v30 }
 0x3fd   : > { %v1351_v31 = vpop.f32.mrf.mxu1 }
 0x3fe   : > { %v1415_v59 = vrot.slane %v1351_v31, 4 }
 0x405   : > { %v1353_v33 = vpop.f32.mrf.mxu1 }
 0x40c   : > { %v1389_v34 = vpop.f32.mrf.mxu3 }
 0x40d   : > { %v1412_v35 = vrot.slane %v1389_v34, 4  ;;  %v1416_v36 = vsel %vm870_vm2, %v1389_v34, %v1415_v59 }
 0x40e   : > { %v1408_v37 = vpop.f32.mrf.mxu0  ;;  %v1424_v0 = vperm.slane %v1416_v36, %v2998_v20 }
 0x40f   : > { %v1414_v62 = vsel %vm870_vm2, %v1412_v35, %v1351_v31  ;;  %v1425_v38 = vrot.slane %v1408_v37, 4 }
 0x410   : > { %v1420_v39 = vperm.slane %v1414_v62, %v2998_v20  ;;  %v1370_v40 = vpop.f32.mrf.mxu2  ;;  %v1451_v50 = vrot.slane %v1424_v0, 4 }
 0x411   : > { %v1426_v41 = vsel %vm870_vm2, %v1425_v38, %v1370_v40  ;;  %v1427_v42 = vrot.slane %v1370_v40, 4  ;;  %v2136_v38 = vld [vmem:[%s2943_s15 + $0x8] sm:$0xff] }
 0x412   : > { %v1439_v43 = vrot.slane %v1420_v39, 4  ;;  %v1432_v44 = vperm.slane %v1426_v41, %v2998_v20  ;;  %1570 = vmatpush.bf16.msra.mxu1 %v2136_v38 }
 0x413   : > { %v1428_v47 = vsel %vm870_vm2, %v1408_v37, %v1427_v42 }
 0x414   : > { %v1436_v51 = vperm.slane %v1428_v47, %v2998_v20  ;;  %v1437_v52 = vrot.slane %v1432_v44, 4  ;;  %v1440_v53 = vsel %vm870_vm2, %v1432_v44, %v1439_v43  ;;  %v1391_v45 = vpop.f32.mrf.mxu3  ;;  %v2285_v47 = vld [vmem:[%s3376_s12] ss:$0 sm:$0xff] }
 0x415   : > { %v1448_v46 = vperm.slane %v1440_v53, %v3007_v32 }
 0x416   : > { %v1438_v54 = vsel %vm870_vm2, %v1437_v52, %v1420_v39  ;;  %v1449_v48 = vrot.slane %v1436_v51, 4  ;;  %v1452_v55 = vsel %vm870_vm2, %v1436_v51, %v1451_v50  ;;  %v1410_v56 = vpop.f32.mrf.mxu0  ;;  %v2135_v39 = vld [vmem:[%s2943_s15] sm:$0xff]  ;;  %s3377_s15 = scalar_lea.vmem [#allocation8], %s2911_s23 }
 0x417   : > { %v1444_v12 = vperm.slane %v1438_v54, %v3007_v32  ;;  %v1460_v57 = vperm.slane %v1452_v55, %v3007_v32  ;;  %v1463_v10 = vrot.slane %v1448_v46, 4  ;;  %1571 = vmatpush.bf16.msra.mxu1 %v2135_v39  ;;  %v2620_v46 = vmov 32.0  }
 0x418   : > { %v1450_v11 = vsel %vm870_vm2, %v1449_v48, %v1424_v0  ;;  %v1372_v58 = vpop.f32.mrf.mxu2  ;;  %2308 = vrcp.f32 %v2620_v46 }
 0x419   : > { %v1456_v60 = vperm.slane %v1450_v11, %v3007_v32  ;;  %v1461_v61 = vrot.slane %v1444_v12, 4  ;;  %v1464_v63 = vsel %vm870_vm2, 0.0, %v1463_v10  ;;  %v1467_v1 = vrot.slane %v1460_v57, 4 }
 0x41a   : > { %v1469_v2 = vsel %vm870_vm2, %v1463_v10, %v1444_v12  ;;  %v1474_v4 = vrot.slane %v1464_v63, 4  ;;  %v2137_v63 = vld [vmem:[%s2952_s11] sm:$0xff] }
 0x41b   : > { %v1462_v5 = vsel %vm870_vm2, 0.0, %v1461_v61  ;;  %v1465_v6 = vrot.slane %v1456_v60, 4  ;;  %v1468_v7 = vsel %vm870_vm2, 0.0, %v1467_v1  ;;  %v1473_v8 = vperm.slane %v1469_v2, %v2998_v20  ;;  %v2138_v61 = vld [vmem:[%s2952_s11 + $0x8] sm:$0xff] }
 0x41c   : > { %v1485_v9 = vrot.slane %v1468_v7, 4  ;;  %v1475_v13 = vsel %vm870_vm2, %v1474_v4, %v1462_v5  ;;  %v1480_v14 = vsel %vm870_vm2, %v1467_v1, %v1456_v60  ;;  %1647 = vmatpush.bf16.msra.mxu2 %v2138_v61 }
 0x41d   : > { %v1466_v15 = vsel %vm870_vm2, 0.0, %v1465_v6  ;;  %v1479_v16 = vperm.slane %v1475_v13, %v2998_v20  ;;  %v1484_v17 = vperm.slane %v1480_v14, %v2998_v20  ;;  %v1493_v18 = vrot.slane %v1473_v8, 4  ;;  %v2286_v14 = vld [vmem:[%s3377_s15] ss:$0 sm:$0xff] }
 0x41e   : > { %v1486_v19 = vsel %vm870_vm2, %v1485_v9, %v1466_v15  ;;  %v2309_v54 = vpop.eup %2308 }
 0x41f   : > { %v1490_v21 = vperm.slane %v1486_v19, %v2998_v20  ;;  %v1494_v22 = vsel %vm870_vm2, %v1479_v16, %v1493_v18  ;;  %v1505_v23 = vrot.slane %v1484_v17, 4  ;;  %v1491_v24 = vrot.slane %v1479_v16, 4  ;;  %v2287_v16 = vld [vmem:[%s3379_s13] ss:$0 sm:$0xff] }
 0x420   : > { %v1502_v25 = vperm.slane %v1494_v22, %v3007_v32  ;;  %v1584_v48 = vmul.f32 32.0, %v2309_v54  ;;  %vm1588_vm7 = vweird.f32 %v2309_v54  ;;  %1648 = vmatpush.bf16.msra.mxu2 %v2137_v63  ;;  %v2142_v22 = vld [vmem:[%s2962_s25 + $0x18] sm:$0xff] }
 0x421   : > { %v1506_v26 = vsel %vm870_vm2, %v1490_v21, %v1505_v23  ;;  %v1492_v27 = vsel %vm870_vm2, %v1491_v24, %v1473_v8  ;;  %v1503_v28 = vrot.slane %v1490_v21, 4  ;;  %1708 = vmatpush.bf16.msra.mxu3 %v2142_v22  ;;  %v2141_v23 = vld [vmem:[%s2962_s25 + $0x10] sm:$0xff]  ;;  %v2140_v24 = vld [vmem:[%s2962_s25 + $0x8] sm:$0xff] }
 0x422   : > { %v1514_v49 = vperm.slane %v1506_v26, %v3007_v32  ;;  %v1521_v29 = vrot.slane %v1502_v25, 4  ;;  %v1498_v30 = vperm.slane %v1492_v27, %v3007_v32  ;;  %v1585_v55 = vsub.f32 1.0, %v1584_v48  ;;  %v2288_v26 = vld [vmem:[%s780_s4] ss:$0 sm:$0xff] }
 0x423   : > { %v1504_v31 = vsel %vm870_vm2, %v1503_v28, %v1484_v17 }
 0x424   : > { %v1522_v20 = vsel %vm870_vm2, %v1514_v49, %v1521_v29  ;;  %v1519_v33 = vrot.slane %v1514_v49, 4  ;;  %v1510_v59 = vperm.slane %v1504_v31, %v3007_v32  ;;  %v1517_v34 = vrot.slane %v1498_v30, 4 }
 0x425   : > { %1532 = vrot.lane.b32.xlu0 %v1522_v20, %s2617_s1  ;;  %v1586_v56 = vmul.f32 %v2309_v54, %v1585_v55  ;;  %1709 = vmatpush.bf16.msra.mxu3 %v2141_v23 }
 0x426   : > { %v1520_v35 = vsel %vm870_vm2, %v1519_v33, %v1502_v25  ;;  %v1515_v36 = vrot.slane %v1510_v59, 4  ;;  %v1518_v37 = vsel %vm870_vm2, %v1510_v59, %v1517_v34  ;;  %v2139_v25 = vld [vmem:[%s2962_s25] sm:$0xff] }
 0x427   : > { %1528 = vrot.lane.b32.xlu1 %v1520_v35, %s2618_s3  ;;  %1524 = vrot.lane.b32.xlu2 %v1518_v37, %s2619_s21  ;;  %v1587_v12 = vadd.f32 %v2309_v54, %v1586_v56 }
 0x428   : > { %v1516_v62 = vsel %vm870_vm2, %v1515_v36, %v1498_v30 }
 0x429   : > { %v3192_v57 = vsel %vm1588_vm7, %v2309_v54, %v1587_v12  ;;  %1710 = vmatpush.bf16.msra.mxu3 %v2140_v24 }
 0x42d   : > { %1711 = vmatpush.bf16.msra.mxu3 %v2139_v25 }
 0x481   : > { %v1525_v32 = vpop.permute.xlu2 %1524 }
 0x482   : > { %v1535_v0 = vsel %vm1206_vm3, %v1516_v62, %v1525_v32  ;;  %v2289_v62 = vld [vmem:[%s788_s16] ss:$0 sm:$0xff]  ;;  %s3382_s16 = scalar_lea.vmem [#allocation9], %s2911_s23 }
 0x483   : > { %v2290_v56 = vld [vmem:[%s3382_s16] ss:$0 sm:$0xff] }
 0x497   : > { %v1533_v41 = vpop.permute.xlu0 %1532 }
 0x499   : > { %v1529_v40 = vpop.permute.xlu1 %1528 }
 0x49a   : > { %v1537_v42 = vsel %vm1536_vm5, %v1535_v0, %v1529_v40 }
 0x49b   : > { %v1539_v43 = vsel %vm1538_vm6, %v1537_v42, %v1533_v41 }
 0x49c   : > { %v1540_v44 = vpack.c.bf16 %v1539_v43, %v1539_v43 }
 0x49e   : > { %2096 = vmatmul.msk.bf16.vlgmr.msra.gmra.mxu1 %vm822_vm1, %v1540_v44 }
 0x51b   : > { %v1573_v50 = vpop.f32.mrf.mxu1 }
 0x51c   : > { %v1574_v51 = vadd.f32 %v2285_v47, %v1573_v50 }
 0x51e   : > { %v1577_v52 = vadd.f32 %v1574_v51, %v2978_v3 }
 0x520   : > { %v1580_v53 = vsel %vm822_vm1, %v1577_v52, 0.0 }
 0x521   : > { %1581 = vadd.xlane.f32.xlu2 %v1580_v53 }
 0x523   : > { %v1575_v45 = vpop.f32.mrf.mxu1 }
 0x594   : > { %v1582_v10 = vpop.xlane.xlu2 %1581 }
 0x595   : > { %v1590_v11 = vmul.f32 %v3192_v57, %v1582_v10  ;;  %v2291_v10 = vld [vmem:[%s791_s30] ss:$0 sm:$0xff]  ;;  %s3384_s30 = sld [smem:[#allocation44_spill]] (!%p2123_p11) }
 0x597   : > { %v1591_v3 = vsub.f32 %v1577_v52, %v1590_v11 }
 0x599   : > { %v1592_v58 = vmul.f32 %v1591_v3, %v1591_v3 }
 0x59b   : > { %v1593_v60 = vsel %vm822_vm1, %v1592_v58, 0.0 }
 0x59c   : > { %1594 = vadd.xlane.f32.xlu0 %v1593_v60 }
 0x60f   : > { %v1595_v1 = vpop.xlane.xlu0 %1594 }
 0x610   : > { %v1596_v2 = vmul.f32 %v1595_v1, %v3192_v57 }
 0x612   : > { %v1597_v4 = vadd.f32 1e-12, %v1596_v2 }
 0x614   : > { %2310 = vrsqrt.f32 %v1597_v4  ;;  %vm1604_vm9 = vweird.f32 %v1597_v4 }
 0x61a   : > { %v2311_v5 = vpop.eup %2310 }
 0x61b   : > { %v1599_v6 = vmul.f32 %v2311_v5, %v1597_v4  ;;  %vm1605_vm8 = vweird.f32 %v2311_v5 }
 0x61c   : > { %vm1606_vm10 = vmor %vm1604_vm9, %vm1605_vm8 }
 0x61d   : > { %v1600_v7 = vmul.f32 %v2311_v5, %v1599_v6 }
 0x61f   : > { %v1601_v8 = vmul.f32 0.5, %v1600_v7 }
 0x621   : > { %v1602_v9 = vsub.f32 1.5, %v1601_v8 }
 0x623   : > { %v1603_v13 = vmul.f32 %v2311_v5, %v1602_v9 }
 0x625   : > { %v1607_v15 = vsel %vm1606_vm10, %v2311_v5, %v1603_v13 }
 0x626   : > { %v1608_v17 = vmul.f32 %v1607_v15, %v1591_v3 }
 0x628   : > { %v1612_v18 = vmul.f32 %v2286_v14, %v1608_v17 }
 0x62a   : > { %v1616_v19 = vadd.f32 %v2287_v16, %v1612_v18 }
 0x62c   : > { %v1617_v21 = vpack.c.bf16 %v1616_v19, %v1616_v19 }
 0x62e   : > { %2105 = vmatmul.msk.bf16.vlgmr.msra.gmra.mxu2 %vm822_vm1, %v1617_v21 }
 0x6b1   : > { %v1650_v27 = vpop.f32.mrf.mxu2 }
 0x6b2   : > { %v1651_v28 = vadd.f32 %v2288_v26, %v1650_v27 }
 0x6b4   : > { %v1654_v49 = vmul.f32 %v1651_v28, %v1651_v28 }
 0x6b6   : > { %v1655_v29 = vmul.f32 %v1654_v49, %v1651_v28 }
 0x6b8   : > { %v1656_v30 = vmul.f32 0.044715, %v1655_v29 }
 0x6b9   : > { %v1652_v31 = vpop.f32.mrf.mxu2 }
 0x6ba   : > { %v1657_v20 = vadd.f32 %v1656_v30, %v1651_v28 }
 0x6bc   : > { %v1658_v33 = vmul.f32 0.7978846, %v1657_v20 }
 0x6be   : > { %2312 = vtanh.f32 %v1658_v33 }
 0x6c4   : > { %v2313_v59 = vpop.eup %2312 }
 0x6c5   : > { %v1660_v34 = vadd.f32 1.0, %v2313_v59 }
 0x6c7   : > { %v1661_v35 = vmul.f32 0.5, %v1660_v34 }
 0x6c9   : > { %v1662_v36 = vmul.f32 %v1661_v35, %v1651_v28 }
 0x6cb   : > { %v1663_v37 = vpack.c.bf16 %v1662_v36, %v1662_v36 }
 0x6cd   : > { %2122 = vmatmul.msk.bf16.vlgmr.msra.gmra.mxu3 %vm1700_vm11, %v1663_v37 }
 0x750   : > { %v1713_v38 = vpop.f32.mrf.mxu3 }
 0x751   : > { %v1714_v39 = vadd.f32 %v2289_v62, %v1713_v38 }
 0x753   : > { %v1717_v32 = vadd.f32 %v1714_v39, %v1616_v19 }
 0x755   : > { %v1720_v0 = vsel %vm822_vm1, %v1717_v32, 0.0 }
 0x756   : > { %1721 = vadd.xlane.f32.xlu1 %v1720_v0 }
 0x758   : > { %v1715_v40 = vpop.f32.mrf.mxu3 }
 0x7c9   : > { %v1722_v41 = vpop.xlane.xlu1 %1721 }
 0x7ca   : > { %v1723_v42 = vmul.f32 %v1722_v41, %v3192_v57 }
 0x7cc   : > { %v1724_v43 = vsub.f32 %v1717_v32, %v1723_v42 }
 0x7ce   : > { %v1725_v44 = vmul.f32 %v1724_v43, %v1724_v43 }
 0x7d0   : > { %v1726_v47 = vsel %vm822_vm1, %v1725_v44, 0.0 }
 0x7d1   : > { %1727 = vadd.xlane.f32.xlu2 %v1726_v47 }
 0x844   : > { %v1728_v50 = vpop.xlane.xlu2 %1727 }
 0x845   : > { %v1729_v51 = vmul.f32 %v1728_v50, %v3192_v57 }
 0x847   : > { %v1730_v52 = vadd.f32 1e-12, %v1729_v51 }
 0x849   : > { %2314 = vrsqrt.f32 %v1730_v52  ;;  %vm1737_vm13 = vweird.f32 %v1730_v52 }
 0x84f   : > { %v2315_v53 = vpop.eup %2314 }
 0x850   : > { %v1732_v45 = vmul.f32 %v2315_v53, %v1730_v52  ;;  %vm1738_vm12 = vweird.f32 %v2315_v53 }
 0x851   : > { %vm1739_vm14 = vmor %vm1737_vm13, %vm1738_vm12 }
 0x852   : > { %v1733_v46 = vmul.f32 %v2315_v53, %v1732_v45 }
 0x854   : > { %v1734_v54 = vmul.f32 0.5, %v1733_v46 }
 0x856   : > { %v1735_v48 = vsub.f32 1.5, %v1734_v54 }
 0x858   : > { %v1736_v55 = vmul.f32 %v2315_v53, %v1735_v48 }
 0x85a   : > { %v1740_v12 = vsel %vm1739_vm14, %v2315_v53, %v1736_v55 }
 0x85b   : > { %v1741_v57 = vmul.f32 %v1740_v12, %v1724_v43 }
 0x85d   : > { %v1745_v11 = vmul.f32 %v2290_v56, %v1741_v57  ;;  %1754 = sbr.rel (%p2123_p11) target bundleno = 2539 (0x9eb), region = 108 }
 0x85f   : > { %v1749_v3 = vadd.f32 %v2291_v10, %v1745_v11 }
 0x861   : > { %1750 = vst.msk [vmem:[#allocation2] sm:$0xff] %vm822_vm1, %v1749_v3 }
 0x862   : > { %v1758_v58 = vld [vmem:[#allocation11 + $0x18] sm:$0xff]  ;;  %v1757_v60 = vld [vmem:[#allocation11 + $0x10] sm:$0xff]  ;;  %v1756_v61 = vld [vmem:[#allocation11 + $0x8] sm:$0xff] }
 0x863   : > { %1778 = vmatpush.msra.mxu0 %v1758_v58  ;;  %v1755_v63 = vld [vmem:[#allocation11] sm:$0xff] }
 0x864   : > { %v2316_v1 = vld [vmem:[%s3384_s30] ss:$0 sm:$0xff] }
 0x865   : > { %1779 = vmatpush.msra.mxu0 %v1757_v60 }
 0x867   : > { %1780 = vmatpush.msra.mxu0 %v1756_v61 }
 0x869   : > { %1781 = vmatpush.msra.mxu0 %v1755_v63 }
 0x86a   : > { %2124 = vmatmul.msk.f32.vlgmr.msra.gmra.mxu0 %vm822_vm1, %v1749_v3 }
 0x8e7   : > { %v1783_v2 = vpop.f32.mrf.mxu0 }
 0x8e8   : > { %v1784_v4 = vadd.f32 %v2316_v1, %v1783_v2 }
 0x8ea   : > { %1786 = vmax.xlane.f32.xlu0 %v1784_v4 }
 0x95d   : > { %v1787_v5 = vpop.xlane.xlu0 %1786 }
 0x95e   : > { %v1788_v6 = vsub.f32 %v1784_v4, %v1787_v5 }
 0x960   : > { %v1789_v7 = vmul.f32 1.442695, %v1788_v6 }
 0x962   : > { %2317 = vpow2.f32 %v1789_v7 }
 0x968   : > { %v2318_v8 = vpop.eup %2317 }
 0x969   : > { %1791 = vadd.xlane.f32.xlu0 %v2318_v8 }
 0x9dc   : > { %v1792_v9 = vpop.xlane.xlu0 %1791 }
 0x9dd   : > { %2319 = vlog2.f32 %v1792_v9 }
 0x9e3   : > { %v2320_v13 = vpop.eup %2319 }
 0x9e4   : > { %v1794_v14 = vmul.f32 0.6931472, %v2320_v13 }
 0x9e6   : > { %v1795_v15 = vadd.f32 %v1794_v14, %v1787_v5 }
 0x9e8   : > { %v1796_v16 = vsub.f32 %v1784_v4, %v1795_v15 }
 0x9ea   : > { %1797 = vst [vmem:[%s2974_s10] sm:$0xff] %v1796_v16 }
 0x9eb PF: > { %s3385_s24 = sld [smem:[#allocation22_spill]]  ;;  %s1811_s15 = sshll.u32 %s2974_s10, 4  ;;  %s1812_s15 = int_to_ptr.vmem [resolvable:$true] %s1811_s15 }
 0x9ec   : > { %s3387_s20 = sld [smem:[#allocation45_spill]]  ;;  %s1799_s18 = scalar_lea.sflag [#allocation5], %s2897_s27 }
 0x9f1   : > { %s2126_s3 = sshll.u32 %s3385_s24, 3 }
 0x9f2   : > { %s3388_s14 = smov %s3387_s20  ;;  %s1809_s12 = scalar_lea.hbm %s3387_s20, %s2126_s3 }
 0x9f3   : > { %s1813_s11 = sshll.u32 %s1809_s12, 4  ;;  %s2491_s26 = scalar_lea.hbm %s3388_s14, 16  ;;  %s1814_s11 = int_to_ptr.hbm [resolvable:$true] %s1813_s11 }
 0x9f4   : > { %s2485_s6 = sshra.s32 %s1814_s11, 4  ;;  %s2486_s6 = int_to_ptr.hbm [resolvable:$true] %s2485_s6 }
 0x9f5   : > { %s2487_s13 = scalar_lea.hbm %s2486_s6, 8  ;;  %p2492_p8 = scmp.lt.s32.totalorder %s2486_s6, %s3388_s14 }
 0x9f6   : > { %p2488_p13 = scmp.ne.s32.totalorder %s2486_s6, %s2487_s13  ;;  %p2493_p9 = scmp.lt.s32.totalorder %s2491_s26, %s2487_s13 }
 0x9f8   : > { %p2489_p0 = pnand %p2488_p13, %p2855_p6  ;;  %p2494_p10 = por %p2493_p9, %p2492_p8 }
 0x9fa   : > { %p2490_p5 = pneg %p2489_p0 }
 0x9fc   : > { %p2495_p7 = pnand %p2494_p10, %p2490_p5 }
 0x9fe   : > { %2498 = shalt.err (!%p2495_p7)
}
 0x9ff   : > { %2155 = dma.vmem_to_hbm [thread:$0]  (%p2855_p6), %s1812_s15, 128, %s1814_s11, %s1799_s18  }
 0xa00 PF: > { %s3389_s27 = sld [smem:[#allocation19_spill]]  ;;  %p2181_p12 = scmp.ge.s32.totalorder %s2605_s28, 2 }
 0xa02   : > { %p2175_p2 = pnand %p2181_p12, %p2862_p4 }
 0xa04   : > { %p2176_p3 = pneg %p2175_p2 }
 0xa06   : > { %s1825_s10 = sand.u32 1, %s3389_s27  }
 0xa07   : > { %s1826_s4 = scalar_lea.sflag [#allocation5], %s1825_s10 }
 0xa08   : > { %2560 = dma.done.wait (%p2176_p3), %s1826_s4, 128  }
 0xa09   : > { %2562 = vsyncadd (%p2176_p3), %s1826_s4, 4294967168  ;;  %s37_s28 = sadd.s32 1, %s2605_s28   ;;  %s3390_s16 = sld [smem:[#allocation18_spill]] }
 0xa0a   : > { %p34_p1 = scmp.ge.s32.totalorder %s37_s28, 6   ;;  %s3391_s20 = sld [smem:[#allocation26_spill]] }
 0xa0b   : > { %s3392_s21 = sld [smem:[#allocation20_spill]]  ;;  %s3399_s18 = smov %s2569_s19 }
 0xa0c   : > { %s3393_s22 = sld [smem:[#allocation21_spill]] }
 0xa0d   : > { %s3394_s23 = sld [smem:[#allocation29_spill]]  ;;  %36 = sbr.rel (!%p34_p1) target bundleno = 30 (0x1e), region = 201 }
 0xa0e   : > { %s3395_s24 = sld [smem:[#allocation23_spill]] }
 0xa0f   : > { %s3396_s25 = sld [smem:[#allocation24_spill]]  ;;  %s3400_s19 = smov %s3390_s16 }
 0xa10   : > { %s3397_s26 = sld [smem:[#allocation25_spill]] }
 0xa11   : > { %s3398_s27 = sld [smem:[#allocation27_spill]] }
 0xa12   :  { %1832 = vsyncpa [#allocation4], 1 }
 0xa13   :  { %1834 = vsyncpa [#allocation4 + $0x1], 1 }
 0xa14   :  { %1835 = vsyncpa [#allocation7], 1 }
 0xa15   :  { %1837 = vsyncpa [#allocation7 + $0x1], 1 }
 0xa16   :  { %1838 = vsyncpa [#allocation10], 1 }
 0xa17   :  { %1840 = vsyncpa [#allocation10 + $0x1], 1 }
 0xa18   :  { %1841 = vsyncpa [#allocation5], 1 }
 0xa19   :  { %1843 = vsyncpa [#allocation5 + $0x1], 1 }

</bundles_post_ra>
